<compile_context>
chip_gen: v6e
topology: v6e:2x2x1
jax: 0.10.0
libtpu: 0.0.40
codegen_flags: <defaults>
</compile_context>

<pallas_src>
import numpy as np
import jax
import jax.numpy as jnp
from jax import lax
from jax.experimental import pallas as pl
from jax.experimental.pallas import tpu as pltpu

# ----------------------------- problem sizes --------------------------------
B, CIN, C = 2, 4, 16          # batch, in_ch, out_ch
H = W = 16                    # input spatial
HP, WP = H // 2, W // 2       # after AvgPool2d(2, 2)
HW, HPWP = H * W, HP * WP
G = 8                         # EMA factor (groups)
CG = C // G                   # channels per group
CINP = 8                      # conv1 input channels padded to a sublane tile
EPS = 1e-5
F32 = jnp.float32

# Halo padding of the scratch row buffers (aligned so the center store lands
# on a 128-lane boundary; tap loads may be unaligned, which is cheap).
PADF = 128                    # full-res buffer pad  (needs >= W + 1 = 17)
PADP = 128                    # pooled-res buffer pad (needs >= WP + 1 = 9)

# Flattened-spatial offsets of the 9 conv taps, k = dh*3 + dw.
OFF_F = tuple((dh - 1) * W + (dw - 1) for dh in range(3) for dw in range(3))
OFF_P = tuple((dh - 1) * WP + (dw - 1) for dh in range(3) for dw in range(3))


# ------------------------------- the kernel ---------------------------------
def lte_block_kernel(x_ref, mkf_ref, mkp_ref, poolT_ref, mhw_ref, eh_ref,
                     ew_ref, smat_ref, smatT_ref, w1p_ref, w2p_ref, w3p_ref,
                     w1x1T_ref, vecs_ref, o_ref, buf_ref, bufp_ref, col_ref):
    x = x_ref[0]                          # (CINP, HW)   channels x spatial
    v = vecs_ref[...]                     # (C, 8) packed per-channel vectors

    # Zero the halo row buffers every step (cheap: ~52 KiB of VMEM stores;
    # must not be gated on program_id==0 because the parallel grid axis may
    # be sharded across cores, each with its own scratch).
    buf_ref[...] = jnp.zeros_like(buf_ref)
    bufp_ref[...] = jnp.zeros_like(bufp_ref)

    # ---- conv1: 3x3 (CIN->C) + folded BN + ReLU, one fused MXU matmul ------
    buf_ref[0:CINP, PADF:PADF + HW] = x
    for k in range(9):
        o = OFF_F[k]
        col_ref[k * CINP:(k + 1) * CINP, :] = (
            buf_ref[0:CINP, PADF + o:PADF + o + HW] * mkf_ref[k:k + 1, :])
    y = jnp.dot(w1p_ref[...], col_ref[0:9 * CINP, :],
                preferred_element_type=F32)                     # (C, HW)
    y = jnp.maximum(y * v[:, 0:1] + v[:, 1:2], 0.0)

    # ---- conv2: 3x3 (C->C) + folded BN + ReLU -------------------------------
    buf_ref[:, PADF:PADF + HW] = y
    for k in range(9):
        o = OFF_F[k]
        col_ref[k * C:(k + 1) * C, :] = (
            buf_ref[:, PADF + o:PADF + o + HW] * mkf_ref[k:k + 1, :])
    y = jnp.dot(w2p_ref[...], col_ref[...],
                preferred_element_type=F32)                     # (C, HW)
    y = jnp.maximum(y * v[:, 2:3] + v[:, 3:4], 0.0)

    # ---- AvgPool2d(2, 2): lane compaction via one small constant matmul -----
    p = jnp.dot(y, poolT_ref[...], preferred_element_type=F32)  # (C, HPWP)

    # ---- EMA attention -------------------------------------------------------
    # row/col means (pool_h / pool_w), both in one (C, HP+WP) matmul
    xhw = jnp.dot(p, mhw_ref[...], preferred_element_type=F32)  # (C, HP+WP)
    shw = jax.nn.sigmoid(
        jnp.dot(w1x1T_ref[...], xhw, preferred_element_type=F32) + v[:, 4:5])
    gh = jnp.dot(shw[:, 0:HP], eh_ref[...], preferred_element_type=F32)
    gw = jnp.dot(shw[:, HP:HP + WP], ew_ref[...], preferred_element_type=F32)
    mod = p * gh * gw                                           # (C, HPWP)

    # GroupNorm(cg, cg) == per-channel normalization over spatial
    mu = jnp.mean(mod, axis=1, keepdims=True)
    var = jnp.mean((mod - mu) ** 2, axis=1, keepdims=True)
    x1 = (mod - mu) * lax.rsqrt(var + EPS) * v[:, 5:6] + v[:, 6:7]

    # grouped 3x3 conv on the pooled maps (block-diagonal packed weight)
    bufp_ref[:, PADP:PADP + HPWP] = p
    for k in range(9):
        o = OFF_P[k]
        col_ref[k * C:(k + 1) * C, 0:HPWP] = (
            bufp_ref[:, PADP + o:PADP + o + HPWP] * mkp_ref[k:k + 1, :])
    x2 = jnp.dot(w3p_ref[...], col_ref[0:9 * C, 0:HPWP],
                 preferred_element_type=F32) + v[:, 7:8]        # (C, HPWP)

    # per-group softmax over pooled channel means (global-max stabilized;
    # subtracting the global max is invariant for each group's softmax)
    m1 = jnp.mean(x1, axis=1, keepdims=True)                    # (C, 1)
    m2 = jnp.mean(x2, axis=1, keepdims=True)
    e1 = jnp.exp(m1 - jnp.max(m1, axis=0, keepdims=True))
    e2 = jnp.exp(m2 - jnp.max(m2, axis=0, keepdims=True))

    ones_sp = jnp.ones((1, HPWP), F32)
    g1n = jnp.dot(smatT_ref[...], e1 * x2, preferred_element_type=F32)
    g1d = jnp.dot(smatT_ref[...], e1 * ones_sp, preferred_element_type=F32)
    g2n = jnp.dot(smatT_ref[...], e2 * x1, preferred_element_type=F32)
    g2d = jnp.dot(smatT_ref[...], e2 * ones_sp, preferred_element_type=F32)
    wmap = (g1n * pl.reciprocal(g1d, approx=True)
            + g2n * pl.reciprocal(g2d, approx=True))            # (G, HPWP)
    gate = jnp.dot(smat_ref[...], jax.nn.sigmoid(wmap),
                   preferred_element_type=F32)                  # (C, HPWP)

    o_ref[0] = (p * gate).astype(o_ref.dtype)


# --------------------------- constant matrices -------------------------------
def make_tap_masks(h, w):
    """(9, h*w) validity mask per 3x3 tap on the flattened spatial axis."""
    m = np.zeros((9, h * w), np.float32)
    for k in range(9):
        dh, dw = k // 3, k % 3
        for i in range(h):
            hi = i + dh - 1
            for j in range(w):
                wi = j + dw - 1
                if 0 <= hi < h and 0 <= wi < w:
                    m[k, i * w + j] = 1.0
    return m


def make_pool_mat_T(h, w):
    """(h*w, hp*wp): right-multiply to average-pool 2x2 on the lane axis."""
    hp, wp = h // 2, w // 2
    m = np.zeros((h * w, hp * wp), np.float32)
    for i in range(hp):
        for j in range(wp):
            q = i * wp + j
            for di in range(2):
                for dj in range(2):
                    m[(2 * i + di) * w + (2 * j + dj), q] = 0.25
    return m


def make_rowcol_mats(hp, wp):
    mhw = np.zeros((hp * wp, hp + wp), np.float32)  # [row means | col means]
    eh = np.zeros((hp, hp * wp), np.float32)        # expand row value over W
    ew = np.zeros((wp, hp * wp), np.float32)        # expand col value over H
    for i in range(hp):
        for j in range(wp):
            q = i * wp + j
            mhw[q, i] = 1.0 / wp
            mhw[q, hp + j] = 1.0 / hp
            eh[i, q] = 1.0
            ew[j, q] = 1.0
    return mhw, eh, ew


def make_group_mats(c, g):
    cg = c // g
    s = np.zeros((c, g), np.float32)
    for ch in range(c):
        s[ch, ch // cg] = 1.0
    return s, s.T.copy()


# ------------------------------ wrapper --------------------------------------
def run_pallas(x_nchw, consts):
    # NCHW -> (B, CINP, H*W): channels on sublane, flattened spatial on lane.
    xf = jnp.concatenate(
        [x_nchw.reshape(B, CIN, HW).astype(F32),
         jnp.zeros((B, CINP - CIN, HW), F32)], axis=1)

    def fullspec(a):
        nd = a.ndim
        return pl.BlockSpec(a.shape, lambda b, nd=nd: (0,) * nd)

    in_specs = [pl.BlockSpec((1, CINP, HW), lambda b: (b, 0, 0))]
    in_specs += [fullspec(a) for a in consts]

    out = pl.pallas_call(
        lte_block_kernel,
        out_shape=jax.ShapeDtypeStruct((B, C, HPWP), F32),
        grid_spec=pltpu.PrefetchScalarGridSpec(
            num_scalar_prefetch=0,
            grid=(B,),
            in_specs=in_specs,
            out_specs=pl.BlockSpec((1, C, HPWP), lambda b: (b, 0, 0)),
            scratch_shapes=[
                pltpu.VMEM((C, HW + 2 * PADF), F32),    # zero-haloed full-res buffer
                pltpu.VMEM((C, HPWP + 2 * PADP), F32),  # zero-haloed pooled buffer
                pltpu.VMEM((9 * C, HW), F32),           # shared im2col staging
            ],
        ),
        compiler_params=pltpu.CompilerParams(
            dimension_semantics=("parallel",)),
    )(xf, *consts)

    return out.reshape(B, C, HP, WP)


# -------------------------- pure-JAX reference -------------------------------
def reference_forward(x, prm):
    def conv3(inp, w9, bias):                      # w9: (9, ci, co), k = dh*3+dw
        ci, co = w9.shape[1], w9.shape[2]
        w_oihw = jnp.transpose(w9.reshape(3, 3, ci, co), (3, 2, 0, 1))
        y = lax.conv_general_dilated(inp, w_oihw, (1, 1), [(1, 1), (1, 1)],
                                     dimension_numbers=('NCHW', 'OIHW', 'NCHW'))
        return y + bias[None, :, None, None]

    y = conv3(x, prm['w1'], prm['b1'])
    y = jnp.maximum(y * prm['s1'][None, :, None, None] + prm['t1'][None, :, None, None], 0.0)
    y = conv3(y, prm['w2'], prm['b2'])
    y = jnp.maximum(y * prm['s2'][None, :, None, None] + prm['t2'][None, :, None, None], 0.0)

    bb, cc, hh2, ww2 = y.shape
    p = y.reshape(bb, cc, hh2 // 2, 2, ww2 // 2, 2).mean(axis=(3, 5))

    hh, ww = p.shape[2], p.shape[3]
    gx = p.reshape(bb * G, CG, hh, ww)
    x_h = gx.mean(axis=3, keepdims=True)
    x_w = jnp.transpose(gx.mean(axis=2, keepdims=True), (0, 1, 3, 2))
    cat = jnp.concatenate([x_h, x_w], axis=2)
    hw_ = jnp.einsum('bihw,io->bohw', cat, prm['w1x1']) + prm['b1x1'][None, :, None, None]
    xh2, xw2 = hw_[:, :, :hh, :], hw_[:, :, hh:, :]
    modv = gx * jax.nn.sigmoid(xh2) * jax.nn.sigmoid(jnp.transpose(xw2, (0, 1, 3, 2)))
    mu = modv.mean(axis=(2, 3), keepdims=True)
    var = ((modv - mu) ** 2).mean(axis=(2, 3), keepdims=True)
    x1 = (modv - mu) / jnp.sqrt(var + EPS) * prm['gn_g'][None, :, None, None] \
         + prm['gn_b'][None, :, None, None]
    w3_oihw = jnp.transpose(prm['w3'].reshape(3, 3, CG, CG), (3, 2, 0, 1))
    x2 = lax.conv_general_dilated(gx, w3_oihw, (1, 1), [(1, 1), (1, 1)],
                                  dimension_numbers=('NCHW', 'OIHW', 'NCHW')) \
         + prm['b3'][None, :, None, None]
    a1 = jax.nn.softmax(x1.mean(axis=(2, 3)), axis=-1)[:, None, :]
    a2 = jax.nn.softmax(x2.mean(axis=(2, 3)), axis=-1)[:, None, :]
    x12 = x2.reshape(bb * G, CG, hh * ww)
    x22 = x1.reshape(bb * G, CG, hh * ww)
    wts = (jnp.matmul(a1, x12) + jnp.matmul(a2, x22)).reshape(bb * G, 1, hh, ww)
    return (gx * jax.nn.sigmoid(wts)).reshape(bb, cc, hh, ww)


# --------------------------------- main --------------------------------------
if __name__ == "__main__":
    key = jax.random.PRNGKey(0)
    ks = jax.random.split(key, 24)

    # deterministic synthetic parameters (same shapes as the nn.Module)
    w1 = jax.random.normal(ks[0], (9, CIN, C), F32) * 0.2
    b1 = jax.random.normal(ks[1], (C,), F32) * 0.1
    g1 = 1.0 + 0.1 * jax.random.normal(ks[2], (C,), F32)
    bt1 = 0.1 * jax.random.normal(ks[3], (C,), F32)
    rm1 = 0.1 * jax.random.normal(ks[4], (C,), F32)
    rv1 = 0.5 + 0.5 * jnp.abs(jax.random.normal(ks[5], (C,), F32))

    w2 = jax.random.normal(ks[6], (9, C, C), F32) * 0.1
    b2 = jax.random.normal(ks[7], (C,), F32) * 0.1
    g2 = 1.0 + 0.1 * jax.random.normal(ks[8], (C,), F32)
    bt2 = 0.1 * jax.random.normal(ks[9], (C,), F32)
    rm2 = 0.1 * jax.random.normal(ks[10], (C,), F32)
    rv2 = 0.5 + 0.5 * jnp.abs(jax.random.normal(ks[11], (C,), F32))

    w1x1 = jax.random.normal(ks[12], (CG, CG), F32) * 0.3     # [ci, co]
    b1x1 = jax.random.normal(ks[13], (CG,), F32) * 0.1
    gn_g = 1.0 + 0.1 * jax.random.normal(ks[14], (CG,), F32)
    gn_b = 0.1 * jax.random.normal(ks[15], (CG,), F32)
    w3 = jax.random.normal(ks[16], (9, CG, CG), F32) * 0.2    # [k, ci, co]
    b3 = jax.random.normal(ks[17], (CG,), F32) * 0.1

    # fold eval-mode BatchNorm (+ conv bias) into per-channel scale/shift
    s1 = g1 / jnp.sqrt(rv1 + EPS); t1 = bt1 - rm1 * s1; sh1 = b1 * s1 + t1
    s2 = g2 / jnp.sqrt(rv2 + EPS); t2 = bt2 - rm2 * s2; sh2 = b2 * s2 + t2

    # all per-channel vectors packed into a single (C, 8) constant
    vecs = jnp.stack([s1, sh1, s2, sh2,
                      jnp.tile(b1x1, G), jnp.tile(gn_g, G),
                      jnp.tile(gn_b, G), jnp.tile(b3, G)], axis=1)

    # packed conv weights: W[co, k*Cin + ci] = w[k, ci, co]
    w1pad = jnp.concatenate([w1, jnp.zeros((9, CINP - CIN, C), F32)], axis=1)
    w1p = jnp.transpose(w1pad, (2, 0, 1)).reshape(C, 9 * CINP)
    w2p = jnp.transpose(w2, (2, 0, 1)).reshape(C, 9 * C)
    w3_blk = jnp.stack([jnp.kron(jnp.eye(G, dtype=F32), w3[k]) for k in range(9)])
    w3p = jnp.transpose(w3_blk, (2, 0, 1)).reshape(C, 9 * C)
    w1x1T = jnp.kron(jnp.eye(G, dtype=F32), w1x1).T

    # small constant structure matrices
    mkf = jnp.asarray(make_tap_masks(H, W))
    mkp = jnp.asarray(make_tap_masks(HP, WP))
    poolT = jnp.asarray(make_pool_mat_T(H, W))
    mhw, eh, ew = (jnp.asarray(m) for m in make_rowcol_mats(HP, WP))
    smat, smatT = (jnp.asarray(m) for m in make_group_mats(C, G))

    consts = [mkf, mkp, poolT, mhw, eh, ew, smat, smatT,
              w1p, w2p, w3p, w1x1T, vecs]

    x = jax.random.normal(ks[18], (B, CIN, H, W), F32)

    out = jax.block_until_ready(run_pallas(x, consts))

    prm = dict(w1=w1, b1=b1, s1=s1, t1=t1, w2=w2, b2=b2, s2=s2, t2=t2,
               w1x1=w1x1, b1x1=b1x1, gn_g=gn_g, gn_b=gn_b, w3=w3, b3=b3)
    ref = reference_forward(x, prm)

    np.testing.assert_allclose(np.asarray(out), np.asarray(ref), rtol=3e-2, atol=3e-2)
    print("KERNEL_OK")
</pallas_src>

<mosaic_0001>
module attributes {stable_mosaic.version = 11 : i64} {
  func.func @lte_block_kernel(%arg0: i32, %arg1: memref<1x8x256xf32, #tpu.memory_space<vmem>>, %arg2: memref<9x256xf32, #tpu.memory_space<vmem>>, %arg3: memref<9x64xf32, #tpu.memory_space<vmem>>, %arg4: memref<256x64xf32, #tpu.memory_space<vmem>>, %arg5: memref<64x16xf32, #tpu.memory_space<vmem>>, %arg6: memref<8x64xf32, #tpu.memory_space<vmem>>, %arg7: memref<8x64xf32, #tpu.memory_space<vmem>>, %arg8: memref<16x8xf32, #tpu.memory_space<vmem>>, %arg9: memref<8x16xf32, #tpu.memory_space<vmem>>, %arg10: memref<16x72xf32, #tpu.memory_space<vmem>>, %arg11: memref<16x144xf32, #tpu.memory_space<vmem>>, %arg12: memref<16x144xf32, #tpu.memory_space<vmem>>, %arg13: memref<16x16xf32, #tpu.memory_space<vmem>>, %arg14: memref<16x8xf32, #tpu.memory_space<vmem>>, %arg15: memref<1x16x64xf32, #tpu.memory_space<vmem>>, %arg16: memref<16x512xf32, #tpu.memory_space<vmem>>, %arg17: memref<16x320xf32, #tpu.memory_space<vmem>>, %arg18: memref<144x256xf32, #tpu.memory_space<vmem>>) attributes {dimension_semantics = [#tpu.dimension_semantics<parallel>], iteration_bounds = array<i64: 2>, scalar_prefetch = 0 : i64, scratch_operands = 3 : i64, tpu.core_type = #tpu.core_type<tc>, window_params = [{transform_indices = @transform_0, window_bounds = array<i64: 1, 8, 256>}, {pipeline_mode = #tpu.pipeline_mode<synchronous>, transform_indices = @transform_1, window_bounds = array<i64: 9, 256>}, {pipeline_mode = #tpu.pipeline_mode<synchronous>, transform_indices = @transform_2, window_bounds = array<i64: 9, 64>}, {pipeline_mode = #tpu.pipeline_mode<synchronous>, transform_indices = @transform_3, window_bounds = array<i64: 256, 64>}, {pipeline_mode = #tpu.pipeline_mode<synchronous>, transform_indices = @transform_4, window_bounds = array<i64: 64, 16>}, {pipeline_mode = #tpu.pipeline_mode<synchronous>, transform_indices = @transform_5, window_bounds = array<i64: 8, 64>}, {pipeline_mode = #tpu.pipeline_mode<synchronous>, transform_indices = @transform_6, window_bounds = array<i64: 8, 64>}, {pipeline_mode = #tpu.pipeline_mode<synchronous>, transform_indices = @transform_7, window_bounds = array<i64: 16, 8>}, {pipeline_mode = #tpu.pipeline_mode<synchronous>, transform_indices = @transform_8, window_bounds = array<i64: 8, 16>}, {pipeline_mode = #tpu.pipeline_mode<synchronous>, transform_indices = @transform_9, window_bounds = array<i64: 16, 72>}, {pipeline_mode = #tpu.pipeline_mode<synchronous>, transform_indices = @transform_10, window_bounds = array<i64: 16, 144>}, {pipeline_mode = #tpu.pipeline_mode<synchronous>, transform_indices = @transform_11, window_bounds = array<i64: 16, 144>}, {pipeline_mode = #tpu.pipeline_mode<synchronous>, transform_indices = @transform_12, window_bounds = array<i64: 16, 16>}, {pipeline_mode = #tpu.pipeline_mode<synchronous>, transform_indices = @transform_13, window_bounds = array<i64: 16, 8>}, {transform_indices = @transform_14, window_bounds = array<i64: 1, 16, 64>}]} {
    %c0 = arith.constant 0 : index
    %c0_0 = arith.constant 0 : index
    %c0_1 = arith.constant 0 : index
    %0 = vector.load %arg1[%c0, %c0_0, %c0_1] : memref<1x8x256xf32, #tpu.memory_space<vmem>>, vector<1x8x256xf32>
    %1 = vector.shape_cast %0 : vector<1x8x256xf32> to vector<8x256xf32>
    %c0_2 = arith.constant 0 : index
    %c0_3 = arith.constant 0 : index
    %2 = vector.load %arg14[%c0_2, %c0_3] : memref<16x8xf32, #tpu.memory_space<vmem>>, vector<16x8xf32>
    %cst = arith.constant 0.000000e+00 : f32
    %3 = vector.broadcast %cst : f32 to vector<16x512xf32>
    %c0_4 = arith.constant 0 : index
    %c0_5 = arith.constant 0 : index
    %4 = vector.load %arg16[%c0_4, %c0_5] : memref<16x512xf32, #tpu.memory_space<vmem>>, vector<16x512xf32>
    tpu.vector_store %arg16[%c0_4, %c0_5], %3 {strides = array<i32>} : memref<16x512xf32, #tpu.memory_space<vmem>>, vector<16x512xf32>,
    %cst_6 = arith.constant 0.000000e+00 : f32
    %5 = vector.broadcast %cst_6 : f32 to vector<16x320xf32>
    %c0_7 = arith.constant 0 : index
    %c0_8 = arith.constant 0 : index
    %6 = vector.load %arg17[%c0_7, %c0_8] : memref<16x320xf32, #tpu.memory_space<vmem>>, vector<16x320xf32>
    tpu.vector_store %arg17[%c0_7, %c0_8], %5 {strides = array<i32>} : memref<16x320xf32, #tpu.memory_space<vmem>>, vector<16x320xf32>,
    %c0_9 = arith.constant 0 : index
    %c128 = arith.constant 128 : index
    %7 = vector.load %arg16[%c0_9, %c128] : memref<16x512xf32, #tpu.memory_space<vmem>>, vector<8x256xf32>
    tpu.vector_store %arg16[%c0_9, %c128], %1 {strides = array<i32>} : memref<16x512xf32, #tpu.memory_space<vmem>>, vector<8x256xf32>,
    %c0_10 = arith.constant 0 : index
    %c111 = arith.constant 111 : index
    %8 = vector.load %arg16[%c0_10, %c111] : memref<16x512xf32, #tpu.memory_space<vmem>>, vector<8x256xf32>
    %c0_11 = arith.constant 0 : index
    %c0_12 = arith.constant 0 : index
    %9 = vector.load %arg2[%c0_11, %c0_12] : memref<9x256xf32, #tpu.memory_space<vmem>>, vector<1x256xf32>
    %10 = vector.broadcast %9 : vector<1x256xf32> to vector<8x256xf32>
    %11 = arith.mulf %8, %10 : vector<8x256xf32>
    %c0_13 = arith.constant 0 : index
    %c0_14 = arith.constant 0 : index
    %12 = vector.load %arg18[%c0_13, %c0_14] : memref<144x256xf32, #tpu.memory_space<vmem>>, vector<8x256xf32>
    tpu.vector_store %arg18[%c0_13, %c0_14], %11 {strides = array<i32>} : memref<144x256xf32, #tpu.memory_space<vmem>>, vector<8x256xf32>,
    %c0_15 = arith.constant 0 : index
    %c112 = arith.constant 112 : index
    %13 = vector.load %arg16[%c0_15, %c112] : memref<16x512xf32, #tpu.memory_space<vmem>>, vector<8x256xf32>
    %c1 = arith.constant 1 : index
    %c0_16 = arith.constant 0 : index
    %14 = vector.load %arg2[%c1, %c0_16] : memref<9x256xf32, #tpu.memory_space<vmem>>, vector<1x256xf32>
    %15 = vector.broadcast %14 : vector<1x256xf32> to vector<8x256xf32>
    %16 = arith.mulf %13, %15 : vector<8x256xf32>
    %c8 = arith.constant 8 : index
    %c0_17 = arith.constant 0 : index
    %17 = vector.load %arg18[%c8, %c0_17] : memref<144x256xf32, #tpu.memory_space<vmem>>, vector<8x256xf32>
    tpu.vector_store %arg18[%c8, %c0_17], %16 {strides = array<i32>} : memref<144x256xf32, #tpu.memory_space<vmem>>, vector<8x256xf32>,
    %c0_18 = arith.constant 0 : index
    %c113 = arith.constant 113 : index
    %18 = vector.load %arg16[%c0_18, %c113] : memref<16x512xf32, #tpu.memory_space<vmem>>, vector<8x256xf32>
    %c2 = arith.constant 2 : index
    %c0_19 = arith.constant 0 : index
    %19 = vector.load %arg2[%c2, %c0_19] : memref<9x256xf32, #tpu.memory_space<vmem>>, vector<1x256xf32>
    %20 = vector.broadcast %19 : vector<1x256xf32> to vector<8x256xf32>
    %21 = arith.mulf %18, %20 : vector<8x256xf32>
    %c16 = arith.constant 16 : index
    %c0_20 = arith.constant 0 : index
    %22 = vector.load %arg18[%c16, %c0_20] : memref<144x256xf32, #tpu.memory_space<vmem>>, vector<8x256xf32>
    tpu.vector_store %arg18[%c16, %c0_20], %21 {strides = array<i32>} : memref<144x256xf32, #tpu.memory_space<vmem>>, vector<8x256xf32>,
    %c0_21 = arith.constant 0 : index
    %c127 = arith.constant 127 : index
    %23 = vector.load %arg16[%c0_21, %c127] : memref<16x512xf32, #tpu.memory_space<vmem>>, vector<8x256xf32>
    %c3 = arith.constant 3 : index
    %c0_22 = arith.constant 0 : index
    %24 = vector.load %arg2[%c3, %c0_22] : memref<9x256xf32, #tpu.memory_space<vmem>>, vector<1x256xf32>
    %25 = vector.broadcast %24 : vector<1x256xf32> to vector<8x256xf32>
    %26 = arith.mulf %23, %25 : vector<8x256xf32>
    %c24 = arith.constant 24 : index
    %c0_23 = arith.constant 0 : index
    %27 = vector.load %arg18[%c24, %c0_23] : memref<144x256xf32, #tpu.memory_space<vmem>>, vector<8x256xf32>
    tpu.vector_store %arg18[%c24, %c0_23], %26 {strides = array<i32>} : memref<144x256xf32, #tpu.memory_space<vmem>>, vector<8x256xf32>,
    %c0_24 = arith.constant 0 : index
    %c128_25 = arith.constant 128 : index
    %28 = vector.load %arg16[%c0_24, %c128_25] : memref<16x512xf32, #tpu.memory_space<vmem>>, vector<8x256xf32>
    %c4 = arith.constant 4 : index
    %c0_26 = arith.constant 0 : index
    %29 = vector.load %arg2[%c4, %c0_26] : memref<9x256xf32, #tpu.memory_space<vmem>>, vector<1x256xf32>
    %30 = vector.broadcast %29 : vector<1x256xf32> to vector<8x256xf32>
    %31 = arith.mulf %28, %30 : vector<8x256xf32>
    %c32 = arith.constant 32 : index
    %c0_27 = arith.constant 0 : index
    %32 = vector.load %arg18[%c32, %c0_27] : memref<144x256xf32, #tpu.memory_space<vmem>>, vector<8x256xf32>
    tpu.vector_store %arg18[%c32, %c0_27], %31 {strides = array<i32>} : memref<144x256xf32, #tpu.memory_space<vmem>>, vector<8x256xf32>,
    %c0_28 = arith.constant 0 : index
    %c129 = arith.constant 129 : index
    %33 = vector.load %arg16[%c0_28, %c129] : memref<16x512xf32, #tpu.memory_space<vmem>>, vector<8x256xf32>
    %c5 = arith.constant 5 : index
    %c0_29 = arith.constant 0 : index
    %34 = vector.load %arg2[%c5, %c0_29] : memref<9x256xf32, #tpu.memory_space<vmem>>, vector<1x256xf32>
    %35 = vector.broadcast %34 : vector<1x256xf32> to vector<8x256xf32>
    %36 = arith.mulf %33, %35 : vector<8x256xf32>
    %c40 = arith.constant 40 : index
    %c0_30 = arith.constant 0 : index
    %37 = vector.load %arg18[%c40, %c0_30] : memref<144x256xf32, #tpu.memory_space<vmem>>, vector<8x256xf32>
    tpu.vector_store %arg18[%c40, %c0_30], %36 {strides = array<i32>} : memref<144x256xf32, #tpu.memory_space<vmem>>, vector<8x256xf32>,
    %c0_31 = arith.constant 0 : index
    %c143 = arith.constant 143 : index
    %38 = vector.load %arg16[%c0_31, %c143] : memref<16x512xf32, #tpu.memory_space<vmem>>, vector<8x256xf32>
    %c6 = arith.constant 6 : index
    %c0_32 = arith.constant 0 : index
    %39 = vector.load %arg2[%c6, %c0_32] : memref<9x256xf32, #tpu.memory_space<vmem>>, vector<1x256xf32>
    %40 = vector.broadcast %39 : vector<1x256xf32> to vector<8x256xf32>
    %41 = arith.mulf %38, %40 : vector<8x256xf32>
    %c48 = arith.constant 48 : index
    %c0_33 = arith.constant 0 : index
    %42 = vector.load %arg18[%c48, %c0_33] : memref<144x256xf32, #tpu.memory_space<vmem>>, vector<8x256xf32>
    tpu.vector_store %arg18[%c48, %c0_33], %41 {strides = array<i32>} : memref<144x256xf32, #tpu.memory_space<vmem>>, vector<8x256xf32>,
    %c0_34 = arith.constant 0 : index
    %c144 = arith.constant 144 : index
    %43 = vector.load %arg16[%c0_34, %c144] : memref<16x512xf32, #tpu.memory_space<vmem>>, vector<8x256xf32>
    %c7 = arith.constant 7 : index
    %c0_35 = arith.constant 0 : index
    %44 = vector.load %arg2[%c7, %c0_35] : memref<9x256xf32, #tpu.memory_space<vmem>>, vector<1x256xf32>
    %45 = vector.broadcast %44 : vector<1x256xf32> to vector<8x256xf32>
    %46 = arith.mulf %43, %45 : vector<8x256xf32>
    %c56 = arith.constant 56 : index
    %c0_36 = arith.constant 0 : index
    %47 = vector.load %arg18[%c56, %c0_36] : memref<144x256xf32, #tpu.memory_space<vmem>>, vector<8x256xf32>
    tpu.vector_store %arg18[%c56, %c0_36], %46 {strides = array<i32>} : memref<144x256xf32, #tpu.memory_space<vmem>>, vector<8x256xf32>,
    %c0_37 = arith.constant 0 : index
    %c145 = arith.constant 145 : index
    %48 = vector.load %arg16[%c0_37, %c145] : memref<16x512xf32, #tpu.memory_space<vmem>>, vector<8x256xf32>
    %c8_38 = arith.constant 8 : index
    %c0_39 = arith.constant 0 : index
    %49 = vector.load %arg2[%c8_38, %c0_39] : memref<9x256xf32, #tpu.memory_space<vmem>>, vector<1x256xf32>
    %50 = vector.broadcast %49 : vector<1x256xf32> to vector<8x256xf32>
    %51 = arith.mulf %48, %50 : vector<8x256xf32>
    %c64 = arith.constant 64 : index
    %c0_40 = arith.constant 0 : index
    %52 = vector.load %arg18[%c64, %c0_40] : memref<144x256xf32, #tpu.memory_space<vmem>>, vector<8x256xf32>
    tpu.vector_store %arg18[%c64, %c0_40], %51 {strides = array<i32>} : memref<144x256xf32, #tpu.memory_space<vmem>>, vector<8x256xf32>,
    %c0_41 = arith.constant 0 : index
    %c0_42 = arith.constant 0 : index
    %53 = vector.load %arg10[%c0_41, %c0_42] : memref<16x72xf32, #tpu.memory_space<vmem>>, vector<16x72xf32>
    %c0_43 = arith.constant 0 : index
    %c0_44 = arith.constant 0 : index
    %54 = vector.load %arg18[%c0_43, %c0_44] : memref<144x256xf32, #tpu.memory_space<vmem>>, vector<72x256xf32>
    %cst_45 = arith.constant dense<0.000000e+00> : vector<16x256xf32>
    %55 = tpu.matmul %53, %54, %cst_45 {dimension_numbers = #tpu.dot_dimension_numbers<[1], [0], [0], [1], [0, 0, 1, 1], [], []>} : vector<16x72xf32>, vector<72x256xf32>, vector<16x256xf32> -> vector<16x256xf32>
    %56 = vector.extract_strided_slice %2 {offsets = [0, 0], sizes = [16, 1], strides = [1, 1]} : vector<16x8xf32> to vector<16x1xf32>
    %57 = vector.broadcast %56 : vector<16x1xf32> to vector<16x256xf32>
    %58 = arith.mulf %55, %57 : vector<16x256xf32>
    %59 = vector.extract_strided_slice %2 {offsets = [0, 1], sizes = [16, 1], strides = [1, 1]} : vector<16x8xf32> to vector<16x1xf32>
    %60 = vector.broadcast %59 : vector<16x1xf32> to vector<16x256xf32>
    %61 = arith.addf %58, %60 : vector<16x256xf32>
    %cst_46 = arith.constant 0.000000e+00 : f32
    %62 = vector.broadcast %cst_46 : f32 to vector<16x256xf32>
    %63 = arith.maximumf %61, %62 : vector<16x256xf32>
    %c0_47 = arith.constant 0 : index
    %c128_48 = arith.constant 128 : index
    %64 = vector.load %arg16[%c0_47, %c128_48] : memref<16x512xf32, #tpu.memory_space<vmem>>, vector<16x256xf32>
    tpu.vector_store %arg16[%c0_47, %c128_48], %63 {strides = array<i32>} : memref<16x512xf32, #tpu.memory_space<vmem>>, vector<16x256xf32>,
    %c0_49 = arith.constant 0 : index
    %c111_50 = arith.constant 111 : index
    %65 = vector.load %arg16[%c0_49, %c111_50] : memref<16x512xf32, #tpu.memory_space<vmem>>, vector<16x256xf32>
    %c0_51 = arith.constant 0 : index
    %c0_52 = arith.constant 0 : index
    %66 = vector.load %arg2[%c0_51, %c0_52] : memref<9x256xf32, #tpu.memory_space<vmem>>, vector<1x256xf32>
    %67 = vector.broadcast %66 : vector<1x256xf32> to vector<16x256xf32>
    %68 = arith.mulf %65, %67 : vector<16x256xf32>
    %c0_53 = arith.constant 0 : index
    %c0_54 = arith.constant 0 : index
    %69 = vector.load %arg18[%c0_53, %c0_54] : memref<144x256xf32, #tpu.memory_space<vmem>>, vector<16x256xf32>
    tpu.vector_store %arg18[%c0_53, %c0_54], %68 {strides = array<i32>} : memref<144x256xf32, #tpu.memory_space<vmem>>, vector<16x256xf32>,
    %c0_55 = arith.constant 0 : index
    %c112_56 = arith.constant 112 : index
    %70 = vector.load %arg16[%c0_55, %c112_56] : memref<16x512xf32, #tpu.memory_space<vmem>>, vector<16x256xf32>
    %c1_57 = arith.constant 1 : index
    %c0_58 = arith.constant 0 : index
    %71 = vector.load %arg2[%c1_57, %c0_58] : memref<9x256xf32, #tpu.memory_space<vmem>>, vector<1x256xf32>
    %72 = vector.broadcast %71 : vector<1x256xf32> to vector<16x256xf32>
    %73 = arith.mulf %70, %72 : vector<16x256xf32>
    %c16_59 = arith.constant 16 : index
    %c0_60 = arith.constant 0 : index
    %74 = vector.load %arg18[%c16_59, %c0_60] : memref<144x256xf32, #tpu.memory_space<vmem>>, vector<16x256xf32>
    tpu.vector_store %arg18[%c16_59, %c0_60], %73 {strides = array<i32>} : memref<144x256xf32, #tpu.memory_space<vmem>>, vector<16x256xf32>,
    %c0_61 = arith.constant 0 : index
    %c113_62 = arith.constant 113 : index
    %75 = vector.load %arg16[%c0_61, %c113_62] : memref<16x512xf32, #tpu.memory_space<vmem>>, vector<16x256xf32>
    %c2_63 = arith.constant 2 : index
    %c0_64 = arith.constant 0 : index
    %76 = vector.load %arg2[%c2_63, %c0_64] : memref<9x256xf32, #tpu.memory_space<vmem>>, vector<1x256xf32>
    %77 = vector.broadcast %76 : vector<1x256xf32> to vector<16x256xf32>
    %78 = arith.mulf %75, %77 : vector<16x256xf32>
    %c32_65 = arith.constant 32 : index
    %c0_66 = arith.constant 0 : index
    %79 = vector.load %arg18[%c32_65, %c0_66] : memref<144x256xf32, #tpu.memory_space<vmem>>, vector<16x256xf32>
    tpu.vector_store %arg18[%c32_65, %c0_66], %78 {strides = array<i32>} : memref<144x256xf32, #tpu.memory_space<vmem>>, vector<16x256xf32>,
    %c0_67 = arith.constant 0 : index
    %c127_68 = arith.constant 127 : index
    %80 = vector.load %arg16[%c0_67, %c127_68] : memref<16x512xf32, #tpu.memory_space<vmem>>, vector<16x256xf32>
    %c3_69 = arith.constant 3 : index
    %c0_70 = arith.constant 0 : index
    %81 = vector.load %arg2[%c3_69, %c0_70] : memref<9x256xf32, #tpu.memory_space<vmem>>, vector<1x256xf32>
    %82 = vector.broadcast %81 : vector<1x256xf32> to vector<16x256xf32>
    %83 = arith.mulf %80, %82 : vector<16x256xf32>
    %c48_71 = arith.constant 48 : index
    %c0_72 = arith.constant 0 : index
    %84 = vector.load %arg18[%c48_71, %c0_72] : memref<144x256xf32, #tpu.memory_space<vmem>>, vector<16x256xf32>
    tpu.vector_store %arg18[%c48_71, %c0_72], %83 {strides = array<i32>} : memref<144x256xf32, #tpu.memory_space<vmem>>, vector<16x256xf32>,
    %c0_73 = arith.constant 0 : index
    %c128_74 = arith.constant 128 : index
    %85 = vector.load %arg16[%c0_73, %c128_74] : memref<16x512xf32, #tpu.memory_space<vmem>>, vector<16x256xf32>
    %c4_75 = arith.constant 4 : index
    %c0_76 = arith.constant 0 : index
    %86 = vector.load %arg2[%c4_75, %c0_76] : memref<9x256xf32, #tpu.memory_space<vmem>>, vector<1x256xf32>
    %87 = vector.broadcast %86 : vector<1x256xf32> to vector<16x256xf32>
    %88 = arith.mulf %85, %87 : vector<16x256xf32>
    %c64_77 = arith.constant 64 : index
    %c0_78 = arith.constant 0 : index
    %89 = vector.load %arg18[%c64_77, %c0_78] : memref<144x256xf32, #tpu.memory_space<vmem>>, vector<16x256xf32>
    tpu.vector_store %arg18[%c64_77, %c0_78], %88 {strides = array<i32>} : memref<144x256xf32, #tpu.memory_space<vmem>>, vector<16x256xf32>,
    %c0_79 = arith.constant 0 : index
    %c129_80 = arith.constant 129 : index
    %90 = vector.load %arg16[%c0_79, %c129_80] : memref<16x512xf32, #tpu.memory_space<vmem>>, vector<16x256xf32>
    %c5_81 = arith.constant 5 : index
    %c0_82 = arith.constant 0 : index
    %91 = vector.load %arg2[%c5_81, %c0_82] : memref<9x256xf32, #tpu.memory_space<vmem>>, vector<1x256xf32>
    %92 = vector.broadcast %91 : vector<1x256xf32> to vector<16x256xf32>
    %93 = arith.mulf %90, %92 : vector<16x256xf32>
    %c80 = arith.constant 80 : index
    %c0_83 = arith.constant 0 : index
    %94 = vector.load %arg18[%c80, %c0_83] : memref<144x256xf32, #tpu.memory_space<vmem>>, vector<16x256xf32>
    tpu.vector_store %arg18[%c80, %c0_83], %93 {strides = array<i32>} : memref<144x256xf32, #tpu.memory_space<vmem>>, vector<16x256xf32>,
    %c0_84 = arith.constant 0 : index
    %c143_85 = arith.constant 143 : index
    %95 = vector.load %arg16[%c0_84, %c143_85] : memref<16x512xf32, #tpu.memory_space<vmem>>, vector<16x256xf32>
    %c6_86 = arith.constant 6 : index
    %c0_87 = arith.constant 0 : index
    %96 = vector.load %arg2[%c6_86, %c0_87] : memref<9x256xf32, #tpu.memory_space<vmem>>, vector<1x256xf32>
    %97 = vector.broadcast %96 : vector<1x256xf32> to vector<16x256xf32>
    %98 = arith.mulf %95, %97 : vector<16x256xf32>
    %c96 = arith.constant 96 : index
    %c0_88 = arith.constant 0 : index
    %99 = vector.load %arg18[%c96, %c0_88] : memref<144x256xf32, #tpu.memory_space<vmem>>, vector<16x256xf32>
    tpu.vector_store %arg18[%c96, %c0_88], %98 {strides = array<i32>} : memref<144x256xf32, #tpu.memory_space<vmem>>, vector<16x256xf32>,
    %c0_89 = arith.constant 0 : index
    %c144_90 = arith.constant 144 : index
    %100 = vector.load %arg16[%c0_89, %c144_90] : memref<16x512xf32, #tpu.memory_space<vmem>>, vector<16x256xf32>
    %c7_91 = arith.constant 7 : index
    %c0_92 = arith.constant 0 : index
    %101 = vector.load %arg2[%c7_91, %c0_92] : memref<9x256xf32, #tpu.memory_space<vmem>>, vector<1x256xf32>
    %102 = vector.broadcast %101 : vector<1x256xf32> to vector<16x256xf32>
    %103 = arith.mulf %100, %102 : vector<16x256xf32>
    %c112_93 = arith.constant 112 : index
    %c0_94 = arith.constant 0 : index
    %104 = vector.load %arg18[%c112_93, %c0_94] : memref<144x256xf32, #tpu.memory_space<vmem>>, vector<16x256xf32>
    tpu.vector_store %arg18[%c112_93, %c0_94], %103 {strides = array<i32>} : memref<144x256xf32, #tpu.memory_space<vmem>>, vector<16x256xf32>,
    %c0_95 = arith.constant 0 : index
    %c145_96 = arith.constant 145 : index
    %105 = vector.load %arg16[%c0_95, %c145_96] : memref<16x512xf32, #tpu.memory_space<vmem>>, vector<16x256xf32>
    %c8_97 = arith.constant 8 : index
    %c0_98 = arith.constant 0 : index
    %106 = vector.load %arg2[%c8_97, %c0_98] : memref<9x256xf32, #tpu.memory_space<vmem>>, vector<1x256xf32>
    %107 = vector.broadcast %106 : vector<1x256xf32> to vector<16x256xf32>
    %108 = arith.mulf %105, %107 : vector<16x256xf32>
    %c128_99 = arith.constant 128 : index
    %c0_100 = arith.constant 0 : index
    %109 = vector.load %arg18[%c128_99, %c0_100] : memref<144x256xf32, #tpu.memory_space<vmem>>, vector<16x256xf32>
    tpu.vector_store %arg18[%c128_99, %c0_100], %108 {strides = array<i32>} : memref<144x256xf32, #tpu.memory_space<vmem>>, vector<16x256xf32>,
    %c0_101 = arith.constant 0 : index
    %c0_102 = arith.constant 0 : index
    %110 = vector.load %arg11[%c0_101, %c0_102] : memref<16x144xf32, #tpu.memory_space<vmem>>, vector<16x144xf32>
    %c0_103 = arith.constant 0 : index
    %c0_104 = arith.constant 0 : index
    %111 = vector.load %arg18[%c0_103, %c0_104] : memref<144x256xf32, #tpu.memory_space<vmem>>, vector<144x256xf32>
    %cst_105 = arith.constant dense<0.000000e+00> : vector<16x256xf32>
    %112 = tpu.matmul %110, %111, %cst_105 {dimension_numbers = #tpu.dot_dimension_numbers<[1], [0], [0], [1], [0, 0, 1, 1], [], []>} : vector<16x144xf32>, vector<144x256xf32>, vector<16x256xf32> -> vector<16x256xf32>
    %113 = vector.extract_strided_slice %2 {offsets = [0, 2], sizes = [16, 1], strides = [1, 1]} : vector<16x8xf32> to vector<16x1xf32>
    %114 = vector.broadcast %113 : vector<16x1xf32> to vector<16x256xf32>
    %115 = arith.mulf %112, %114 : vector<16x256xf32>
    %116 = vector.extract_strided_slice %2 {offsets = [0, 3], sizes = [16, 1], strides = [1, 1]} : vector<16x8xf32> to vector<16x1xf32>
    %117 = vector.broadcast %116 : vector<16x1xf32> to vector<16x256xf32>
    %118 = arith.addf %115, %117 : vector<16x256xf32>
    %cst_106 = arith.constant 0.000000e+00 : f32
    %119 = vector.broadcast %cst_106 : f32 to vector<16x256xf32>
    %120 = arith.maximumf %118, %119 : vector<16x256xf32>
    %c0_107 = arith.constant 0 : index
    %c0_108 = arith.constant 0 : index
    %121 = vector.load %arg4[%c0_107, %c0_108] : memref<256x64xf32, #tpu.memory_space<vmem>>, vector<256x64xf32>
    %cst_109 = arith.constant dense<0.000000e+00> : vector<16x64xf32>
    %122 = tpu.matmul %120, %121, %cst_109 {dimension_numbers = #tpu.dot_dimension_numbers<[1], [0], [0], [1], [0, 0, 1, 1], [], []>} : vector<16x256xf32>, vector<256x64xf32>, vector<16x64xf32> -> vector<16x64xf32>
    %c0_110 = arith.constant 0 : index
    %c0_111 = arith.constant 0 : index
    %123 = vector.load %arg5[%c0_110, %c0_111] : memref<64x16xf32, #tpu.memory_space<vmem>>, vector<64x16xf32>
    %cst_112 = arith.constant dense<0.000000e+00> : vector<16x16xf32>
    %124 = tpu.matmul %122, %123, %cst_112 {dimension_numbers = #tpu.dot_dimension_numbers<[1], [0], [0], [1], [0, 0, 1, 1], [], []>} : vector<16x64xf32>, vector<64x16xf32>, vector<16x16xf32> -> vector<16x16xf32>
    %c0_113 = arith.constant 0 : index
    %c0_114 = arith.constant 0 : index
    %125 = vector.load %arg13[%c0_113, %c0_114] : memref<16x16xf32, #tpu.memory_space<vmem>>, vector<16x16xf32>
    %cst_115 = arith.constant dense<0.000000e+00> : vector<16x16xf32>
    %126 = tpu.matmul %125, %124, %cst_115 {dimension_numbers = #tpu.dot_dimension_numbers<[1], [0], [0], [1], [0, 0, 1, 1], [], []>} : vector<16x16xf32>, vector<16x16xf32>, vector<16x16xf32> -> vector<16x16xf32>
    %127 = vector.extract_strided_slice %2 {offsets = [0, 4], sizes = [16, 1], strides = [1, 1]} : vector<16x8xf32> to vector<16x1xf32>
    %128 = vector.broadcast %127 : vector<16x1xf32> to vector<16x16xf32>
    %129 = arith.addf %126, %128 : vector<16x16xf32>
    %130 = arith.negf %129 : vector<16x16xf32>
    %131 = math.exp %130 : vector<16x16xf32>
    %cst_116 = arith.constant 1.000000e+00 : f32
    %132 = vector.broadcast %cst_116 : f32 to vector<16x16xf32>
    %133 = arith.addf %132, %131 : vector<16x16xf32>
    %134 = arith.divf %132, %133 : vector<16x16xf32>
    %135 = vector.extract_strided_slice %134 {offsets = [0, 0], sizes = [16, 8], strides = [1, 1]} : vector<16x16xf32> to vector<16x8xf32>
    %c0_117 = arith.constant 0 : index
    %c0_118 = arith.constant 0 : index
    %136 = vector.load %arg6[%c0_117, %c0_118] : memref<8x64xf32, #tpu.memory_space<vmem>>, vector<8x64xf32>
    %cst_119 = arith.constant dense<0.000000e+00> : vector<16x64xf32>
    %137 = tpu.matmul %135, %136, %cst_119 {dimension_numbers = #tpu.dot_dimension_numbers<[1], [0], [0], [1], [0, 0, 1, 1], [], []>} : vector<16x8xf32>, vector<8x64xf32>, vector<16x64xf32> -> vector<16x64xf32>
    %138 = vector.extract_strided_slice %134 {offsets = [0, 8], sizes = [16, 8], strides = [1, 1]} : vector<16x16xf32> to vector<16x8xf32>
    %c0_120 = arith.constant 0 : index
    %c0_121 = arith.constant 0 : index
    %139 = vector.load %arg7[%c0_120, %c0_121] : memref<8x64xf32, #tpu.memory_space<vmem>>, vector<8x64xf32>
    %cst_122 = arith.constant dense<0.000000e+00> : vector<16x64xf32>
    %140 = tpu.matmul %138, %139, %cst_122 {dimension_numbers = #tpu.dot_dimension_numbers<[1], [0], [0], [1], [0, 0, 1, 1], [], []>} : vector<16x8xf32>, vector<8x64xf32>, vector<16x64xf32> -> vector<16x64xf32>
    %141 = arith.mulf %122, %137 : vector<16x64xf32>
    %142 = arith.mulf %141, %140 : vector<16x64xf32>
    %cst_123 = arith.constant dense<0.000000e+00> : vector<16xf32>
    %143 = vector.multi_reduction <add>, %142, %cst_123 [1] : vector<16x64xf32> to vector<16xf32>
    %144 = vector.shape_cast %143 : vector<16xf32> to vector<16x1xf32>
    %cst_124 = arith.constant 6.400000e+01 : f32
    %145 = vector.broadcast %cst_124 : f32 to vector<16x1xf32>
    %146 = arith.divf %144, %145 : vector<16x1xf32>
    %147 = vector.broadcast %146 : vector<16x1xf32> to vector<16x64xf32>
    %148 = arith.subf %142, %147 : vector<16x64xf32>
    %149 = arith.mulf %148, %148 : vector<16x64xf32>
    %cst_125 = arith.constant dense<0.000000e+00> : vector<16xf32>
    %150 = vector.multi_reduction <add>, %149, %cst_125 [1] : vector<16x64xf32> to vector<16xf32>
    %151 = vector.shape_cast %150 : vector<16xf32> to vector<16x1xf32>
    %cst_126 = arith.constant 6.400000e+01 : f32
    %152 = vector.broadcast %cst_126 : f32 to vector<16x1xf32>
    %153 = arith.divf %151, %152 : vector<16x1xf32>
    %154 = vector.broadcast %146 : vector<16x1xf32> to vector<16x64xf32>
    %155 = arith.subf %142, %154 : vector<16x64xf32>
    %cst_127 = arith.constant 9.99999974E-6 : f32
    %156 = vector.broadcast %cst_127 : f32 to vector<16x1xf32>
    %157 = arith.addf %153, %156 : vector<16x1xf32>
    %158 = math.rsqrt %157 : vector<16x1xf32>
    %159 = vector.broadcast %158 : vector<16x1xf32> to vector<16x64xf32>
    %160 = arith.mulf %155, %159 : vector<16x64xf32>
    %161 = vector.extract_strided_slice %2 {offsets = [0, 5], sizes = [16, 1], strides = [1, 1]} : vector<16x8xf32> to vector<16x1xf32>
    %162 = vector.broadcast %161 : vector<16x1xf32> to vector<16x64xf32>
    %163 = arith.mulf %160, %162 : vector<16x64xf32>
    %164 = vector.extract_strided_slice %2 {offsets = [0, 6], sizes = [16, 1], strides = [1, 1]} : vector<16x8xf32> to vector<16x1xf32>
    %165 = vector.broadcast %164 : vector<16x1xf32> to vector<16x64xf32>
    %166 = arith.addf %163, %165 : vector<16x64xf32>
    %c0_128 = arith.constant 0 : index
    %c128_129 = arith.constant 128 : index
    %167 = vector.load %arg17[%c0_128, %c128_129] : memref<16x320xf32, #tpu.memory_space<vmem>>, vector<16x64xf32>
    tpu.vector_store %arg17[%c0_128, %c128_129], %122 {strides = array<i32>} : memref<16x320xf32, #tpu.memory_space<vmem>>, vector<16x64xf32>,
    %c0_130 = arith.constant 0 : index
    %c119 = arith.constant 119 : index
    %168 = vector.load %arg17[%c0_130, %c119] : memref<16x320xf32, #tpu.memory_space<vmem>>, vector<16x64xf32>
    %c0_131 = arith.constant 0 : index
    %c0_132 = arith.constant 0 : index
    %169 = vector.load %arg3[%c0_131, %c0_132] : memref<9x64xf32, #tpu.memory_space<vmem>>, vector<1x64xf32>
    %170 = vector.broadcast %169 : vector<1x64xf32> to vector<16x64xf32>
    %171 = arith.mulf %168, %170 : vector<16x64xf32>
    %c0_133 = arith.constant 0 : index
    %c0_134 = arith.constant 0 : index
    %172 = vector.load %arg18[%c0_133, %c0_134] : memref<144x256xf32, #tpu.memory_space<vmem>>, vector<16x64xf32>
    tpu.vector_store %arg18[%c0_133, %c0_134], %171 {strides = array<i32>} : memref<144x256xf32, #tpu.memory_space<vmem>>, vector<16x64xf32>,
    %c0_135 = arith.constant 0 : index
    %c120 = arith.constant 120 : index
    %173 = vector.load %arg17[%c0_135, %c120] : memref<16x320xf32, #tpu.memory_space<vmem>>, vector<16x64xf32>
    %c1_136 = arith.constant 1 : index
    %c0_137 = arith.constant 0 : index
    %174 = vector.load %arg3[%c1_136, %c0_137] : memref<9x64xf32, #tpu.memory_space<vmem>>, vector<1x64xf32>
    %175 = vector.broadcast %174 : vector<1x64xf32> to vector<16x64xf32>
    %176 = arith.mulf %173, %175 : vector<16x64xf32>
    %c16_138 = arith.constant 16 : index
    %c0_139 = arith.constant 0 : index
    %177 = vector.load %arg18[%c16_138, %c0_139] : memref<144x256xf32, #tpu.memory_space<vmem>>, vector<16x64xf32>
    tpu.vector_store %arg18[%c16_138, %c0_139], %176 {strides = array<i32>} : memref<144x256xf32, #tpu.memory_space<vmem>>, vector<16x64xf32>,
    %c0_140 = arith.constant 0 : index
    %c121 = arith.constant 121 : index
    %178 = vector.load %arg17[%c0_140, %c121] : memref<16x320xf32, #tpu.memory_space<vmem>>, vector<16x64xf32>
    %c2_141 = arith.constant 2 : index
    %c0_142 = arith.constant 0 : index
    %179 = vector.load %arg3[%c2_141, %c0_142] : memref<9x64xf32, #tpu.memory_space<vmem>>, vector<1x64xf32>
    %180 = vector.broadcast %179 : vector<1x64xf32> to vector<16x64xf32>
    %181 = arith.mulf %178, %180 : vector<16x64xf32>
    %c32_143 = arith.constant 32 : index
    %c0_144 = arith.constant 0 : index
    %182 = vector.load %arg18[%c32_143, %c0_144] : memref<144x256xf32, #tpu.memory_space<vmem>>, vector<16x64xf32>
    tpu.vector_store %arg18[%c32_143, %c0_144], %181 {strides = array<i32>} : memref<144x256xf32, #tpu.memory_space<vmem>>, vector<16x64xf32>,
    %c0_145 = arith.constant 0 : index
    %c127_146 = arith.constant 127 : index
    %183 = vector.load %arg17[%c0_145, %c127_146] : memref<16x320xf32, #tpu.memory_space<vmem>>, vector<16x64xf32>
    %c3_147 = arith.constant 3 : index
    %c0_148 = arith.constant 0 : index
    %184 = vector.load %arg3[%c3_147, %c0_148] : memref<9x64xf32, #tpu.memory_space<vmem>>, vector<1x64xf32>
    %185 = vector.broadcast %184 : vector<1x64xf32> to vector<16x64xf32>
    %186 = arith.mulf %183, %185 : vector<16x64xf32>
    %c48_149 = arith.constant 48 : index
    %c0_150 = arith.constant 0 : index
    %187 = vector.load %arg18[%c48_149, %c0_150] : memref<144x256xf32, #tpu.memory_space<vmem>>, vector<16x64xf32>
    tpu.vector_store %arg18[%c48_149, %c0_150], %186 {strides = array<i32>} : memref<144x256xf32, #tpu.memory_space<vmem>>, vector<16x64xf32>,
    %c0_151 = arith.constant 0 : index
    %c128_152 = arith.constant 128 : index
    %188 = vector.load %arg17[%c0_151, %c128_152] : memref<16x320xf32, #tpu.memory_space<vmem>>, vector<16x64xf32>
    %c4_153 = arith.constant 4 : index
    %c0_154 = arith.constant 0 : index
    %189 = vector.load %arg3[%c4_153, %c0_154] : memref<9x64xf32, #tpu.memory_space<vmem>>, vector<1x64xf32>
    %190 = vector.broadcast %189 : vector<1x64xf32> to vector<16x64xf32>
    %191 = arith.mulf %188, %190 : vector<16x64xf32>
    %c64_155 = arith.constant 64 : index
    %c0_156 = arith.constant 0 : index
    %192 = vector.load %arg18[%c64_155, %c0_156] : memref<144x256xf32, #tpu.memory_space<vmem>>, vector<16x64xf32>
    tpu.vector_store %arg18[%c64_155, %c0_156], %191 {strides = array<i32>} : memref<144x256xf32, #tpu.memory_space<vmem>>, vector<16x64xf32>,
    %c0_157 = arith.constant 0 : index
    %c129_158 = arith.constant 129 : index
    %193 = vector.load %arg17[%c0_157, %c129_158] : memref<16x320xf32, #tpu.memory_space<vmem>>, vector<16x64xf32>
    %c5_159 = arith.constant 5 : index
    %c0_160 = arith.constant 0 : index
    %194 = vector.load %arg3[%c5_159, %c0_160] : memref<9x64xf32, #tpu.memory_space<vmem>>, vector<1x64xf32>
    %195 = vector.broadcast %194 : vector<1x64xf32> to vector<16x64xf32>
    %196 = arith.mulf %193, %195 : vector<16x64xf32>
    %c80_161 = arith.constant 80 : index
    %c0_162 = arith.constant 0 : index
    %197 = vector.load %arg18[%c80_161, %c0_162] : memref<144x256xf32, #tpu.memory_space<vmem>>, vector<16x64xf32>
    tpu.vector_store %arg18[%c80_161, %c0_162], %196 {strides = array<i32>} : memref<144x256xf32, #tpu.memory_space<vmem>>, vector<16x64xf32>,
    %c0_163 = arith.constant 0 : index
    %c135 = arith.constant 135 : index
    %198 = vector.load %arg17[%c0_163, %c135] : memref<16x320xf32, #tpu.memory_space<vmem>>, vector<16x64xf32>
    %c6_164 = arith.constant 6 : index
    %c0_165 = arith.constant 0 : index
    %199 = vector.load %arg3[%c6_164, %c0_165] : memref<9x64xf32, #tpu.memory_space<vmem>>, vector<1x64xf32>
    %200 = vector.broadcast %199 : vector<1x64xf32> to vector<16x64xf32>
    %201 = arith.mulf %198, %200 : vector<16x64xf32>
    %c96_166 = arith.constant 96 : index
    %c0_167 = arith.constant 0 : index
    %202 = vector.load %arg18[%c96_166, %c0_167] : memref<144x256xf32, #tpu.memory_space<vmem>>, vector<16x64xf32>
    tpu.vector_store %arg18[%c96_166, %c0_167], %201 {strides = array<i32>} : memref<144x256xf32, #tpu.memory_space<vmem>>, vector<16x64xf32>,
    %c0_168 = arith.constant 0 : index
    %c136 = arith.constant 136 : index
    %203 = vector.load %arg17[%c0_168, %c136] : memref<16x320xf32, #tpu.memory_space<vmem>>, vector<16x64xf32>
    %c7_169 = arith.constant 7 : index
    %c0_170 = arith.constant 0 : index
    %204 = vector.load %arg3[%c7_169, %c0_170] : memref<9x64xf32, #tpu.memory_space<vmem>>, vector<1x64xf32>
    %205 = vector.broadcast %204 : vector<1x64xf32> to vector<16x64xf32>
    %206 = arith.mulf %203, %205 : vector<16x64xf32>
    %c112_171 = arith.constant 112 : index
    %c0_172 = arith.constant 0 : index
    %207 = vector.load %arg18[%c112_171, %c0_172] : memref<144x256xf32, #tpu.memory_space<vmem>>, vector<16x64xf32>
    tpu.vector_store %arg18[%c112_171, %c0_172], %206 {strides = array<i32>} : memref<144x256xf32, #tpu.memory_space<vmem>>, vector<16x64xf32>,
    %c0_173 = arith.constant 0 : index
    %c137 = arith.constant 137 : index
    %208 = vector.load %arg17[%c0_173, %c137] : memref<16x320xf32, #tpu.memory_space<vmem>>, vector<16x64xf32>
    %c8_174 = arith.constant 8 : index
    %c0_175 = arith.constant 0 : index
    %209 = vector.load %arg3[%c8_174, %c0_175] : memref<9x64xf32, #tpu.memory_space<vmem>>, vector<1x64xf32>
    %210 = vector.broadcast %209 : vector<1x64xf32> to vector<16x64xf32>
    %211 = arith.mulf %208, %210 : vector<16x64xf32>
    %c128_176 = arith.constant 128 : index
    %c0_177 = arith.constant 0 : index
    %212 = vector.load %arg18[%c128_176, %c0_177] : memref<144x256xf32, #tpu.memory_space<vmem>>, vector<16x64xf32>
    tpu.vector_store %arg18[%c128_176, %c0_177], %211 {strides = array<i32>} : memref<144x256xf32, #tpu.memory_space<vmem>>, vector<16x64xf32>,
    %c0_178 = arith.constant 0 : index
    %c0_179 = arith.constant 0 : index
    %213 = vector.load %arg12[%c0_178, %c0_179] : memref<16x144xf32, #tpu.memory_space<vmem>>, vector<16x144xf32>
    %c0_180 = arith.constant 0 : index
    %c0_181 = arith.constant 0 : index
    %214 = vector.load %arg18[%c0_180, %c0_181] : memref<144x256xf32, #tpu.memory_space<vmem>>, vector<144x64xf32>
    %cst_182 = arith.constant dense<0.000000e+00> : vector<16x64xf32>
    %215 = tpu.matmul %213, %214, %cst_182 {dimension_numbers = #tpu.dot_dimension_numbers<[1], [0], [0], [1], [0, 0, 1, 1], [], []>} : vector<16x144xf32>, vector<144x64xf32>, vector<16x64xf32> -> vector<16x64xf32>
    %216 = vector.extract_strided_slice %2 {offsets = [0, 7], sizes = [16, 1], strides = [1, 1]} : vector<16x8xf32> to vector<16x1xf32>
    %217 = vector.broadcast %216 : vector<16x1xf32> to vector<16x64xf32>
    %218 = arith.addf %215, %217 : vector<16x64xf32>
    %cst_183 = arith.constant dense<0.000000e+00> : vector<16xf32>
    %219 = vector.multi_reduction <add>, %166, %cst_183 [1] : vector<16x64xf32> to vector<16xf32>
    %220 = vector.shape_cast %219 : vector<16xf32> to vector<16x1xf32>
    %cst_184 = arith.constant 6.400000e+01 : f32
    %221 = vector.broadcast %cst_184 : f32 to vector<16x1xf32>
    %222 = arith.divf %220, %221 : vector<16x1xf32>
    %cst_185 = arith.constant dense<0.000000e+00> : vector<16xf32>
    %223 = vector.multi_reduction <add>, %218, %cst_185 [1] : vector<16x64xf32> to vector<16xf32>
    %224 = vector.shape_cast %223 : vector<16xf32> to vector<16x1xf32>
    %cst_186 = arith.constant 6.400000e+01 : f32
    %225 = vector.broadcast %cst_186 : f32 to vector<16x1xf32>
    %226 = arith.divf %224, %225 : vector<16x1xf32>
    %cst_187 = arith.constant dense<0xFF800000> : vector<1xf32>
    %227 = vector.multi_reduction <maximumf>, %222, %cst_187 [0] : vector<16x1xf32> to vector<1xf32>
    %228 = vector.shape_cast %227 : vector<1xf32> to vector<1x1xf32>
    %229 = vector.broadcast %228 : vector<1x1xf32> to vector<16x1xf32>
    %230 = arith.subf %222, %229 : vector<16x1xf32>
    %231 = math.exp %230 : vector<16x1xf32>
    %cst_188 = arith.constant dense<0xFF800000> : vector<1xf32>
    %232 = vector.multi_reduction <maximumf>, %226, %cst_188 [0] : vector<16x1xf32> to vector<1xf32>
    %233 = vector.shape_cast %232 : vector<1xf32> to vector<1x1xf32>
    %234 = vector.broadcast %233 : vector<1x1xf32> to vector<16x1xf32>
    %235 = arith.subf %226, %234 : vector<16x1xf32>
    %236 = math.exp %235 : vector<16x1xf32>
    %cst_189 = arith.constant 1.000000e+00 : f32
    %237 = vector.broadcast %cst_189 : f32 to vector<1x64xf32>
    %c0_190 = arith.constant 0 : index
    %c0_191 = arith.constant 0 : index
    %238 = vector.load %arg9[%c0_190, %c0_191] : memref<8x16xf32, #tpu.memory_space<vmem>>, vector<8x16xf32>
    %239 = vector.broadcast %231 : vector<16x1xf32> to vector<16x64xf32>
    %240 = arith.mulf %239, %218 : vector<16x64xf32>
    %cst_192 = arith.constant dense<0.000000e+00> : vector<8x64xf32>
    %241 = tpu.matmul %238, %240, %cst_192 {dimension_numbers = #tpu.dot_dimension_numbers<[1], [0], [0], [1], [0, 0, 1, 1], [], []>} : vector<8x16xf32>, vector<16x64xf32>, vector<8x64xf32> -> vector<8x64xf32>
    %c0_193 = arith.constant 0 : index
    %c0_194 = arith.constant 0 : index
    %242 = vector.load %arg9[%c0_193, %c0_194] : memref<8x16xf32, #tpu.memory_space<vmem>>, vector<8x16xf32>
    %243 = vector.broadcast %231 : vector<16x1xf32> to vector<16x64xf32>
    %244 = vector.broadcast %237 : vector<1x64xf32> to vector<16x64xf32>
    %245 = arith.mulf %243, %244 : vector<16x64xf32>
    %cst_195 = arith.constant dense<0.000000e+00> : vector<8x64xf32>
    %246 = tpu.matmul %242, %245, %cst_195 {dimension_numbers = #tpu.dot_dimension_numbers<[1], [0], [0], [1], [0, 0, 1, 1], [], []>} : vector<8x16xf32>, vector<16x64xf32>, vector<8x64xf32> -> vector<8x64xf32>
    %c0_196 = arith.constant 0 : index
    %c0_197 = arith.constant 0 : index
    %247 = vector.load %arg9[%c0_196, %c0_197] : memref<8x16xf32, #tpu.memory_space<vmem>>, vector<8x16xf32>
    %248 = vector.broadcast %236 : vector<16x1xf32> to vector<16x64xf32>
    %249 = arith.mulf %248, %166 : vector<16x64xf32>
    %cst_198 = arith.constant dense<0.000000e+00> : vector<8x64xf32>
    %250 = tpu.matmul %247, %249, %cst_198 {dimension_numbers = #tpu.dot_dimension_numbers<[1], [0], [0], [1], [0, 0, 1, 1], [], []>} : vector<8x16xf32>, vector<16x64xf32>, vector<8x64xf32> -> vector<8x64xf32>
    %c0_199 = arith.constant 0 : index
    %c0_200 = arith.constant 0 : index
    %251 = vector.load %arg9[%c0_199, %c0_200] : memref<8x16xf32, #tpu.memory_space<vmem>>, vector<8x16xf32>
    %252 = vector.broadcast %236 : vector<16x1xf32> to vector<16x64xf32>
    %253 = vector.broadcast %237 : vector<1x64xf32> to vector<16x64xf32>
    %254 = arith.mulf %252, %253 : vector<16x64xf32>
    %cst_201 = arith.constant dense<0.000000e+00> : vector<8x64xf32>
    %255 = tpu.matmul %251, %254, %cst_201 {dimension_numbers = #tpu.dot_dimension_numbers<[1], [0], [0], [1], [0, 0, 1, 1], [], []>} : vector<8x16xf32>, vector<16x64xf32>, vector<8x64xf32> -> vector<8x64xf32>
    %256 = tpu.reciprocal %246 {approx = true} : vector<8x64xf32> -> vector<8x64xf32>
    %257 = arith.mulf %241, %256 : vector<8x64xf32>
    %258 = tpu.reciprocal %255 {approx = true} : vector<8x64xf32> -> vector<8x64xf32>
    %259 = arith.mulf %250, %258 : vector<8x64xf32>
    %260 = arith.addf %257, %259 : vector<8x64xf32>
    %c0_202 = arith.constant 0 : index
    %c0_203 = arith.constant 0 : index
    %261 = vector.load %arg8[%c0_202, %c0_203] : memref<16x8xf32, #tpu.memory_space<vmem>>, vector<16x8xf32>
    %262 = arith.negf %260 : vector<8x64xf32>
    %263 = math.exp %262 : vector<8x64xf32>
    %cst_204 = arith.constant 1.000000e+00 : f32
    %264 = vector.broadcast %cst_204 : f32 to vector<8x64xf32>
    %265 = arith.addf %264, %263 : vector<8x64xf32>
    %266 = arith.divf %264, %265 : vector<8x64xf32>
    %cst_205 = arith.constant dense<0.000000e+00> : vector<16x64xf32>
    %267 = tpu.matmul %261, %266, %cst_205 {dimension_numbers = #tpu.dot_dimension_numbers<[1], [0], [0], [1], [0, 0, 1, 1], [], []>} : vector<16x8xf32>, vector<8x64xf32>, vector<16x64xf32> -> vector<16x64xf32>
    %268 = arith.mulf %122, %267 : vector<16x64xf32>
    %c0_206 = arith.constant 0 : index
    %c0_207 = arith.constant 0 : index
    %c0_208 = arith.constant 0 : index
    %269 = vector.load %arg15[%c0_206, %c0_207, %c0_208] : memref<1x16x64xf32, #tpu.memory_space<vmem>>, vector<1x16x64xf32>
    %270 = vector.shape_cast %269 : vector<1x16x64xf32> to vector<16x64xf32>
    %271 = vector.shape_cast %268 : vector<16x64xf32> to vector<1x16x64xf32>
    tpu.vector_store %arg15[%c0_206, %c0_207, %c0_208], %271 {strides = array<i32>} : memref<1x16x64xf32, #tpu.memory_space<vmem>>, vector<1x16x64xf32>,
    return
  }
  func.func @transform_0(%arg0: i32) -> (i32, i32, i32) {
    %c0_i32 = arith.constant 0 : i32
    %c0_i32_0 = arith.constant 0 : i32
    %c0_i32_1 = arith.constant 0 : i32
    return %arg0, %c0_i32, %c0_i32_0 : i32, i32, i32
  }
  func.func @transform_1(%arg0: i32) -> (i32, i32) {
    %c0_i32 = arith.constant 0 : i32
    %c0_i32_0 = arith.constant 0 : i32
    %c0_i32_1 = arith.constant 0 : i32
    return %c0_i32, %c0_i32_0 : i32, i32
  }
  func.func @transform_2(%arg0: i32) -> (i32, i32) {
    %c0_i32 = arith.constant 0 : i32
    %c0_i32_0 = arith.constant 0 : i32
    %c0_i32_1 = arith.constant 0 : i32
    return %c0_i32, %c0_i32_0 : i32, i32
  }
  func.func @transform_3(%arg0: i32) -> (i32, i32) {
    %c0_i32 = arith.constant 0 : i32
    %c0_i32_0 = arith.constant 0 : i32
    %c0_i32_1 = arith.constant 0 : i32
    return %c0_i32, %c0_i32_0 : i32, i32
  }
  func.func @transform_4(%arg0: i32) -> (i32, i32) {
    %c0_i32 = arith.constant 0 : i32
    %c0_i32_0 = arith.constant 0 : i32
    %c0_i32_1 = arith.constant 0 : i32
    return %c0_i32, %c0_i32_0 : i32, i32
  }
  func.func @transform_5(%arg0: i32) -> (i32, i32) {
    %c0_i32 = arith.constant 0 : i32
    %c0_i32_0 = arith.constant 0 : i32
    %c0_i32_1 = arith.constant 0 : i32
    return %c0_i32, %c0_i32_0 : i32, i32
  }
  func.func @transform_6(%arg0: i32) -> (i32, i32) {
    %c0_i32 = arith.constant 0 : i32
    %c0_i32_0 = arith.constant 0 : i32
    %c0_i32_1 = arith.constant 0 : i32
    return %c0_i32, %c0_i32_0 : i32, i32
  }
  func.func @transform_7(%arg0: i32) -> (i32, i32) {
    %c0_i32 = arith.constant 0 : i32
    %c0_i32_0 = arith.constant 0 : i32
    %c0_i32_1 = arith.constant 0 : i32
    return %c0_i32, %c0_i32_0 : i32, i32
  }
  func.func @transform_8(%arg0: i32) -> (i32, i32) {
    %c0_i32 = arith.constant 0 : i32
    %c0_i32_0 = arith.constant 0 : i32
    %c0_i32_1 = arith.constant 0 : i32
    return %c0_i32, %c0_i32_0 : i32, i32
  }
  func.func @transform_9(%arg0: i32) -> (i32, i32) {
    %c0_i32 = arith.constant 0 : i32
    %c0_i32_0 = arith.constant 0 : i32
    %c0_i32_1 = arith.constant 0 : i32
    return %c0_i32, %c0_i32_0 : i32, i32
  }
  func.func @transform_10(%arg0: i32) -> (i32, i32) {
    %c0_i32 = arith.constant 0 : i32
    %c0_i32_0 = arith.constant 0 : i32
    %c0_i32_1 = arith.constant 0 : i32
    return %c0_i32, %c0_i32_0 : i32, i32
  }
  func.func @transform_11(%arg0: i32) -> (i32, i32) {
    %c0_i32 = arith.constant 0 : i32
    %c0_i32_0 = arith.constant 0 : i32
    %c0_i32_1 = arith.constant 0 : i32
    return %c0_i32, %c0_i32_0 : i32, i32
  }
  func.func @transform_12(%arg0: i32) -> (i32, i32) {
    %c0_i32 = arith.constant 0 : i32
    %c0_i32_0 = arith.constant 0 : i32
    %c0_i32_1 = arith.constant 0 : i32
    return %c0_i32, %c0_i32_0 : i32, i32
  }
  func.func @transform_13(%arg0: i32) -> (i32, i32) {
    %c0_i32 = arith.constant 0 : i32
    %c0_i32_0 = arith.constant 0 : i32
    %c0_i32_1 = arith.constant 0 : i32
    return %c0_i32, %c0_i32_0 : i32, i32
  }
  func.func @transform_14(%arg0: i32) -> (i32, i32, i32) {
    %c0_i32 = arith.constant 0 : i32
    %c0_i32_0 = arith.constant 0 : i32
    %c0_i32_1 = arith.constant 0 : i32
    return %arg0, %c0_i32, %c0_i32_0 : i32, i32, i32
  }
}

</mosaic_0001>

<bundles_post_ra>
// kernel: tpu_custom_call.1
= control target key start
LH: loop header
LB: loop body
LE: loop exit
PB: predicated region body
PF: predicated region fallthrough
CT: control target
= control target key end

     0   :  { %s4410_s0 = inlined_call_operand.vmem [shape: f32[2,8,256], index: 0, kind: input, shape index: {}]   ;;  %s4411_s1 = inlined_call_operand.vmem [shape: f32[9,256], index: 1, kind: input, shape index: {}]   ;;  %s4412_s2 = inlined_call_operand.vmem [shape: f32[9,64], index: 2, kind: input, shape index: {}]   ;;  %s4413_s3 = inlined_call_operand.vmem [shape: f32[256,64], index: 3, kind: input, shape index: {}]   ;;  %s4414_s4 = inlined_call_operand.vmem [shape: f32[64,16], index: 4, kind: input, shape index: {}]   ;;  %s4415_s5 = inlined_call_operand.vmem [shape: f32[8,64], index: 5, kind: input, shape index: {}]   ;;  %s4416_s6 = inlined_call_operand.vmem [shape: f32[8,64], index: 6, kind: input, shape index: {}]   ;;  %s4417_s7 = inlined_call_operand.vmem [shape: f32[16,8], index: 7, kind: input, shape index: {}]   ;;  %s4418_s8 = inlined_call_operand.vmem [shape: f32[8,16], index: 8, kind: input, shape index: {}]   ;;  %s4419_s9 = inlined_call_operand.vmem [shape: f32[16,72], index: 9, kind: input, shape index: {}]   ;;  %s4420_s10 = inlined_call_operand.vmem [shape: f32[16,144], index: 10, kind: input, shape index: {}]   ;;  %s4421_s11 = inlined_call_operand.vmem [shape: f32[16,144], index: 11, kind: input, shape index: {}]   ;;  %s4422_s12 = inlined_call_operand.vmem [shape: f32[16,16], index: 12, kind: input, shape index: {}]   ;;  %s4423_s13 = inlined_call_operand.vmem [shape: f32[16,8], index: 13, kind: input, shape index: {}]   ;;  %s4424_s14 = inlined_call_operand.hbm [shape: f32[2,16,64], index: 14, kind: output, shape index: {}]  }
   0x1   :  { %4448 = sst [smem:[#allocation13_spill]] %s4410_s0 }
   0x2   :  { %19 = vsyncpa [#allocation6], 0 }
   0x3   :  { %21 = vsyncpa [#allocation6 + $0x1], 0  ;;  %s3481_s29 = smov 0   ;;  %s3483_s30 = smov 0  }
   0x4   :  { %s3485_s15 = smov 0   ;;  %s3487_s16 = smov 0  }
   0x5 LB: > { %4449 = sst [smem:[#allocation8_spill]] %s3366_s29  ;;  %s3502_s17 = sadd.s32 4294967295, %s3378_s16   ;;  %s3378_s16 = sphi %s3487_s16, %s4468_s16   ;;  %s3374_s15 = sphi %s3485_s15, %s4470_s15   ;;  %s3370_s30 = sphi %s3483_s30, %s4472_s30   ;;  %s3366_s29 = sphi %s3481_s29, %s4471_s29  }
   0x6   : > { %4450 = sst [smem:[#allocation9_spill]] %s3374_s15  ;;  %s3005_s18 = sadd.s32 4294967294, %s3378_s16  }
   0x7   : > { %s3506_s19 = sadd.s32 1, %s3378_s16   ;;  %s333_s20 = sadd.s32 1, %s3374_s15 }
   0x8   : > { %4451 = sst [smem:[#allocation10_spill]] %s3506_s19  ;;  %s330_s21 = ssub.s32 %s3378_s16, %s3506_s19 }
   0x9   : > { %p343_p0 = scmp.ne.s32.totalorder %s3374_s15, %s3370_s30  ;;  %p331_p1 = scmp.eq.s32.totalorder %s330_s21, 0 }
   0xa   : > { %p344_p2 = scmp.eq.s32.totalorder %s3502_s17, 1  ;;  %p349_p3 = scmp.ne.s32.totalorder %s3370_s30, %s3366_s29 }
   0xb   : > { %p350_p4 = scmp.eq.s32.totalorder %s3005_s18, 1  ;;  %p3008_p7 = scmp.ge.s32.totalorder %s3378_s16, 1 }
   0xc   : > { %s3517_s22 = scalar_select %p331_p1, %s3374_s15, %s333_s20  }
   0xd   : > { %p3519_p5 = por %p344_p2, %p343_p0  ;;  %p3523_p6 = por %p350_p4, %p349_p3 }
   0xe   : > { %4452 = sst [smem:[#allocation11_spill]] %s3517_s22  ;;  %p415_p8 = scmp.lt.s32.totalorder %s3378_s16, 3 }
   0xf   : > { %s4454_s24 = scalar_select %p3523_p6, 1, 0 }
  0x10   : > { %p416_p9 = pnand %p3008_p7, %p415_p8 }
  0x11   : > { %4455 = sst [smem:[#allocation12_spill]] %s4454_s24  ;;  %s4425_s18 = smov (!%p416_p9), 17  }
  0x12   : > { %419 = sbr.rel (%p416_p9) target bundleno = 2802 (0xaf2), region = 76  ;;  %s4427_s20 = smov (!%p416_p9), 16  }
  0x13   : > { %s4429_s28 = smov (!%p416_p9), 15   ;;  %s4437_s21 = smov (!%p416_p9), 111  }
  0x14   : > { %p461_p10 = scmp.lt.s32.totalorder (!%p416_p9), %s3502_s17, 1  ;;  %s4456_s0 = sld [smem:[#allocation13_spill]] (!%p416_p9) }
  0x15   : > { %s4460_s26 = smov (!%p416_p9), 15   ;;  %s4463_s22 = smov (!%p416_p9), 112  }
  0x16   : > { %s3395_s19 = smov (!%p416_p9), 7   ;;  %s3397_s29 = smov (!%p416_p9), 121  }
  0x17   : > { %v492_v0 = vlaneseq  ;;  %v3019_v2 = vld [vmem:[%s4411_s1 + $0x10] ss:$8 sm:$0x3]  ;;  %v3018_v3 = vld [vmem:[%s4411_s1 + $0x7] ss:$8 sm:$0x3] }
  0x18   : > { %v3017_v10 = vld [vmem:[%s4411_s1 + $0x6] ss:$8 sm:$0x3]  ;;  %v3016_v13 = vld [vmem:[%s4411_s1 + $0x5] ss:$8 sm:$0x3] }
  0x19   : > { %v493_v1 = vshrl.u32 %v492_v0, 7  ;;  %v3014_v16 = vld [vmem:[%s4411_s1 + $0x3] ss:$8 sm:$0x3]  ;;  %s462_s25 = scalar_select %p461_p10, %s3502_s17, 1  ;;  %vm521_vm0 = vcmask 138240  }
  0x1a   : > { %v3013_v19 = vld [vmem:[%s4411_s1 + $0x2] ss:$8 sm:$0x3]  ;;  %v3012_v22 = vld [vmem:[%s4411_s1 + $0x1] ss:$8 sm:$0x3] }
  0x1b   : > { %v3535_v4 = vsub.s32 0, %v493_v1  ;;  %v3537_v5 = vsub.s32 1, %v493_v1  ;;  %v490_v25 = vld [vmem:[%s4411_s1] ss:$8 sm:$0x3]  ;;  %vm563_vm1 = vcmask 130048  }
  0x1c   : > { %vm605_vm2 = vcmask 121856   ;;  %vm647_vm3 = vcmask 7168   ;;  %vm630_vm4 = vcmask 1039360   ;;  %vm588_vm5 = vcmask 924672   ;;  %s3398_s24 = smov 9  }
  0x1d   : > { %v802_v6 = vrot.slane %v3019_v2, %v3535_v4  ;;  %v762_v7 = vrot.slane %v3018_v3, %v3535_v4  ;;  %v806_v8 = vrot.slane %v3019_v2, %v3537_v5  ;;  %v766_v9 = vrot.slane %v3018_v3, %v3537_v5 }
  0x1e   : > { %v726_v11 = vrot.slane %v3017_v10, %v3537_v5  ;;  %v722_v12 = vrot.slane %v3017_v10, %v3535_v4  ;;  %v686_v14 = vrot.slane %v3016_v13, %v3537_v5  ;;  %v682_v15 = vrot.slane %v3016_v13, %v3535_v4 }
  0x1f   : > { %807 = vrot.lane.b32.xlu0 %v802_v6, %s4425_s18  ;;  %767 = vrot.lane.b32.xlu1 %v762_v7, %s4427_s20  ;;  %v625_v17 = vrot.slane %v3014_v16, %v3537_v5  ;;  %v621_v18 = vrot.slane %v3014_v16, %v3535_v4  ;;  %v583_v20 = vrot.slane %v3013_v19, %v3537_v5  ;;  %vm546_vm6 = vcmask 916480  }
  0x20   : > { %v579_v21 = vrot.slane %v3013_v19, %v3535_v4  ;;  %v537_v23 = vrot.slane %v3012_v22, %v3535_v4  ;;  %v541_v24 = vrot.slane %v3012_v22, %v3537_v5  ;;  %v499_v26 = vrot.slane %v490_v25, %v3537_v5  ;;  %v3659_v19 = vld [vmem:[%s4423_s13] sm:$0xff] }
  0x21   : > { %v495_v27 = vrot.slane %v490_v25, %v3535_v4  ;;  %vm504_vm7 = vcmask 908288   ;;  %v3388_v10 = vmov 0.0   ;;  %v3389_v16 = vmov 0  }
  0x22   : > { %478 = vst [vmem:[#allocation3] sm:$0xff] %v3388_v10  ;;  %479 = vst [vmem:[#allocation3 + $0x8] sm:$0xff] %v3388_v10  ;;  %924 = vmatprep.mubr.f32.mxu0 %v3388_v10  ;;  %3274 = vset.pattern.permute.xlu1 %v3389_v16  ;;  %vm853_vm8 = vcmask 588800   ;;  %vm480_vm9 = vcmask 523264   ;;  %vm1926_vm10 = vcmask 64512   ;;  %vm2245_vm11 = vcmask 56320  }
  0x23   : > { %809 = vrot.lane.b32.xlu0 %v806_v8, %s4425_s18  ;;  %769 = vrot.lane.b32.xlu1 %v766_v9, %s4427_s20  ;;  %s4431_s18 = smov 1   ;;  %s4433_s20 = smov 127   ;;  %483 = vst [vmem:[#allocation3 + $0x20] sm:$0xff] %v3388_v10  ;;  %vm2174_vm12 = vcmask 72704   ;;  %vm3403_vm13 = vmmov 0  }
  0x24   : > { %3273 = vset.pattern.permute.xlu0 %v3389_v16 }
  0x27   : > { %729 = vrot.lane.b32.xlu1 %v726_v11, %s4429_s28  ;;  %727 = vrot.lane.b32.xlu0 %v722_v12, %s4429_s28  ;;  %s4435_s28 = smov 113  }
  0x2b   : > { %689 = vrot.lane.b32.xlu1 %v686_v14, %s4431_s18  ;;  %687 = vrot.lane.b32.xlu0 %v682_v15, %s4431_s18  ;;  %s4439_s18 = smov 112  }
  0x2f   : > { %628 = vrot.lane.b32.xlu1 %v625_v17, %s4433_s20  ;;  %626 = vrot.lane.b32.xlu0 %v621_v18, %s4433_s20  ;;  %s3065_s20 = sshll.u32 %s462_s25, 4  ;;  %s4459_s25 = smov 1   ;;  %v3652_v18 = vld [vmem:[%s4423_s13 + $0x8] sm:$0xff] }
  0x30   : > { %s465_s27 = scalar_lea.vmem %s4456_s0, %s3065_s20  ;;  %s4457_s20 = smov 113  }
  0x31   : > { %v3594_v28 = vld [vmem:[%s465_s27] sm:$0xff]  ;;  %v3607_v48 = vld [vmem:[%s465_s27 + $0x8] sm:$0xff]  ;;  %s4461_s27 = smov 16   ;;  %s4464_s0 = smov 111  }
  0x33   : > { %586 = vrot.lane.b32.xlu1 %v583_v20, %s4435_s28  ;;  %584 = vrot.lane.b32.xlu0 %v579_v21, %s4435_s28  ;;  %s4458_s28 = smov 127   ;;  %v3027_v20 = vld [vmem:[%s4411_s1 + $0x6] ss:$8 sm:$0x3]  ;;  %v3390_v21 = vmov 1  }
  0x34   : > { %v1306_v22 = vrot.slane %v3027_v20, %v3535_v4 }
  0x37   : > { %542 = vrot.lane.b32.xlu0 %v537_v23, %s4439_s18  ;;  %544 = vrot.lane.b32.xlu1 %v541_v24, %s4439_s18  ;;  %v3028_v23 = vld [vmem:[%s4411_s1 + $0x7] ss:$8 sm:$0x3]  ;;  %v3026_v24 = vld [vmem:[%s4411_s1 + $0x5] ss:$8 sm:$0x3] }
  0x38   : > { %v1366_v25 = vrot.slane %v3028_v23, %v3535_v4 }
  0x3b   : > { %502 = vrot.lane.b32.xlu1 %v499_v26, %s4437_s21  ;;  %500 = vrot.lane.b32.xlu0 %v495_v27, %s4437_s21  ;;  %v1246_v26 = vrot.slane %v3026_v24, %v3535_v4  ;;  %v3024_v27 = vld [vmem:[%s4411_s1 + $0x3] ss:$8 sm:$0x3] }
  0x91   : > { %v808_v29 = vpop.permute.xlu0 %807  ;;  %v768_v30 = vpop.permute.xlu1 %767 }
  0x92   : > { %v815_v31 = vmul.f32 %v808_v29, %v3594_v28  ;;  %v775_v38 = vmul.f32 %v768_v30, %v3594_v28 }
  0x94   : > { %821 = vrot.lane.b32.xlu0 %v815_v31, %s4437_s21  ;;  %v3023_v31 = vld [vmem:[%s4411_s1 + $0x2] ss:$8 sm:$0x3] }
  0x95   : > { %v810_v32 = vpop.permute.xlu0 %809  ;;  %v770_v33 = vpop.permute.xlu1 %769 }
  0x96   : > { %v817_v34 = vmul.f32 0.0, %v810_v32  ;;  %v777_v35 = vmul.f32 0.0, %v770_v33  ;;  %v811_v57 = vsel %vm521_vm0, %v808_v29, %v810_v32  ;;  %v771_v60 = vsel %vm563_vm1, %v768_v30, %v770_v33 }
  0x97   : > { %v816_v59 = vmul.f32 %v811_v57, %v3607_v48  ;;  %v776_v63 = vmul.f32 %v771_v60, %v3607_v48  ;;  %v1370_v29 = vrot.slane %v3028_v23, %v3537_v5  ;;  %v1162_v30 = vrot.slane %v3024_v27, %v3535_v4 }
  0x98   : > { %825 = vrot.lane.b32.xlu1 %v817_v34, %s4437_s21  ;;  %785 = vrot.lane.b32.xlu0 %v777_v35, %s4439_s18  ;;  %v1310_v32 = vrot.slane %v3027_v20, %v3537_v5  ;;  %v1102_v33 = vrot.slane %v3023_v31, %v3535_v4  ;;  %v3022_v34 = vld [vmem:[%s4411_s1 + $0x1] ss:$8 sm:$0x3]  ;;  %v1250_v35 = vrot.slane %v3026_v24, %v3537_v5 }
  0x99   : > { %v730_v36 = vpop.permute.xlu1 %729  ;;  %v728_v37 = vpop.permute.xlu0 %727 }
  0x9a   : > { %v735_v39 = vmul.f32 %v728_v37, %v3594_v28  ;;  %v737_v40 = vmul.f32 0.0, %v730_v36  ;;  %v731_v61 = vsel %vm605_vm2, %v728_v37, %v730_v36  ;;  %v1042_v36 = vrot.slane %v3022_v34, %v3535_v4  ;;  %v977_v37 = vld [vmem:[%s4411_s1] ss:$8 sm:$0x3] }
  0x9b   : > { %v736_v62 = vmul.f32 %v731_v61, %v3607_v48 }
  0x9c   : > { %781 = vrot.lane.b32.xlu1 %v775_v38, %s4439_s18  ;;  %741 = vrot.lane.b32.xlu0 %v735_v39, %s4457_s20  ;;  %v1166_v38 = vrot.slane %v3024_v27, %v3537_v5  ;;  %v982_v39 = vrot.slane %v977_v37, %v3535_v4 }
  0x9d   : > { %v690_v41 = vpop.permute.xlu1 %689  ;;  %v688_v42 = vpop.permute.xlu0 %687 }
  0x9e   : > { %v697_v43 = vmul.f32 0.0, %v690_v41  ;;  %v695_v44 = vmul.f32 %v688_v42, %v3594_v28  ;;  %v691_v0 = vsel %vm647_vm3, %v688_v42, %v690_v41  ;;  %v1106_v41 = vrot.slane %v3023_v31, %v3537_v5  ;;  %v833_v31 = vld [vmem:[%s4419_s9] sm:$0xff] }
  0x9f   : > { %v696_v2 = vmul.f32 %v691_v0, %v3607_v48  ;;  %v3015_v0 = vld [vmem:[%s4411_s1 + $0x4] ss:$8 sm:$0x3] }
  0xa0   : > { %745 = vrot.lane.b32.xlu1 %v737_v40, %s4457_s20  ;;  %705 = vrot.lane.b32.xlu0 %v697_v43, %s4458_s28  ;;  %v3029_v40 = vld [vmem:[%s4411_s1 + $0x10] ss:$8 sm:$0x3]  ;;  %v1046_v43 = vrot.slane %v3022_v34, %v3537_v5 }
  0xa1   : > { %v629_v45 = vpop.permute.xlu1 %628  ;;  %v627_v46 = vpop.permute.xlu0 %626  ;;  %v1426_v42 = vrot.slane %v3029_v40, %v3535_v4 }
  0xa2   : > { %v635_v47 = vmul.f32 0.0, %v627_v46  ;;  %v637_v49 = vmul.f32 %v629_v45, %v3607_v48  ;;  %v631_v1 = vsel %vm630_vm4, %v627_v46, %v629_v45  ;;  %v1430_v45 = vrot.slane %v3029_v40, %v3537_v5 }
  0xa3   : > { %v636_v3 = vmul.f32 %v631_v1, %v3594_v28 }
  0xa4   : > { %641 = vrot.lane.b32.xlu0 %v635_v47, %s4459_s25  ;;  %701 = vrot.lane.b32.xlu1 %v695_v44, %s4458_s28  ;;  %v986_v44 = vrot.slane %v977_v37, %v3537_v5 }
  0xa5   : > { %v587_v50 = vpop.permute.xlu1 %586  ;;  %v585_v51 = vpop.permute.xlu0 %584 }
  0xa6   : > { %v595_v52 = vmul.f32 %v587_v50, %v3607_v48  ;;  %v593_v53 = vmul.f32 0.0, %v585_v51  ;;  %v589_v8 = vsel %vm588_vm5, %v585_v51, %v587_v50 }
  0xa7   : > { %v594_v12 = vmul.f32 %v589_v8, %v3594_v28  ;;  %v662_v8 = vrot.slane %v3015_v0, %v3535_v4 }
  0xa8   : > { %603 = vrot.lane.b32.xlu0 %v595_v52, %s4460_s26  ;;  %645 = vrot.lane.b32.xlu1 %v637_v49, %s4459_s25 }
  0xa9   : > { %v543_v54 = vpop.permute.xlu0 %542  ;;  %v545_v55 = vpop.permute.xlu1 %544 }
  0xaa   : > { %v551_v56 = vmul.f32 0.0, %v543_v54  ;;  %v553_v58 = vmul.f32 %v545_v55, %v3607_v48  ;;  %v547_v9 = vsel %vm546_vm6, %v543_v54, %v545_v55 }
  0xab   : > { %v552_v13 = vmul.f32 %v547_v9, %v3594_v28 }
  0xac   : > { %557 = vrot.lane.b32.xlu0 %v551_v56, %s4461_s27  ;;  %599 = vrot.lane.b32.xlu1 %v593_v53, %s4460_s26 }
  0xad   : > { %v503_v6 = vpop.permute.xlu1 %502  ;;  %v501_v7 = vpop.permute.xlu0 %500 }
  0xae   : > { %v505_v11 = vsel %vm504_vm7, %v501_v7, %v503_v6  ;;  %v511_v14 = vmul.f32 %v503_v6, %v3607_v48  ;;  %v509_v17 = vmul.f32 0.0, %v501_v7 }
  0xaf   : > { %v510_v15 = vmul.f32 %v505_v11, %v3594_v28 }
  0xb0   : > { %823 = vrot.lane.b32.xlu0 %v816_v59, %s4437_s21  ;;  %561 = vrot.lane.b32.xlu1 %v553_v58, %s4461_s27  ;;  %s4462_s21 = smov 17  }
  0xb4   : > { %743 = vrot.lane.b32.xlu0 %v736_v62, %s4457_s20  ;;  %783 = vrot.lane.b32.xlu1 %v776_v63, %s4439_s18  ;;  %s3399_s18 = smov 119  }
  0xb8   : > { %703 = vrot.lane.b32.xlu1 %v696_v2, %s4458_s28  ;;  %643 = vrot.lane.b32.xlu0 %v636_v3, %s4459_s25  ;;  %v666_v3 = vrot.slane %v3015_v0, %v3537_v5 }
  0xbc   : > { %601 = vrot.lane.b32.xlu1 %v594_v12, %s4460_s26  ;;  %559 = vrot.lane.b32.xlu0 %v552_v13, %s4461_s27 }
  0xc0   : > { %519 = vrot.lane.b32.xlu0 %v511_v14, %s4462_s21  ;;  %517 = vrot.lane.b32.xlu1 %v510_v15, %s4462_s21  ;;  %v670_v14 = vmul.f32 %v666_v3, %v3607_v48 }
  0xc4   : > { %515 = vrot.lane.b32.xlu1 %v509_v17, %s4462_s21  ;;  %944 = vperm.xlu0 %3273, %v3652_v18   ;;  %v669_v17 = vmul.f32 %v662_v8, %v3594_v28  ;;  %v3025_v8 = vld [vmem:[%s4411_s1 + $0x4] ss:$8 sm:$0x3] }
  0xc8   : > { %939 = vperm.xlu1 %3274, %v3659_v19   ;;  %3276 = vset.pattern.permute.xlu0 %v3390_v21 }
  0xc9   : > { %952 = vperm.xlu0 %3276, %v3659_v19  }
  0xcc   : > { %3275 = vset.pattern.permute.xlu1 %v3390_v21 }
  0xcd   : > { %956 = vperm.xlu1 %3275, %v3652_v18   ;;  %1311 = vrot.lane.b32.xlu0 %v1306_v22, %s4460_s26 }
  0xd1   : > { %1371 = vrot.lane.b32.xlu1 %v1366_v25, %s4461_s27  ;;  %1251 = vrot.lane.b32.xlu0 %v1246_v26, %s4459_s25 }
  0xd5   : > { %1373 = vrot.lane.b32.xlu1 %v1370_v29, %s4461_s27  ;;  %1167 = vrot.lane.b32.xlu0 %v1162_v30, %s4458_s28 }
  0xd9   : > { %1313 = vrot.lane.b32.xlu1 %v1310_v32, %s4460_s26  ;;  %1107 = vrot.lane.b32.xlu0 %v1102_v33, %s4457_s20  ;;  %v834_v33 = vld [vmem:[%s4419_s9 + $0x8] sm:$0xff] }
  0xdd   : > { %1253 = vrot.lane.b32.xlu1 %v1250_v35, %s4459_s25  ;;  %1047 = vrot.lane.b32.xlu0 %v1042_v36, %s4463_s22 }
  0xe1   : > { %1169 = vrot.lane.b32.xlu1 %v1166_v38, %s4458_s28  ;;  %987 = vrot.lane.b32.xlu0 %v982_v39, %s4464_s0 }
  0xe5   : > { %1109 = vrot.lane.b32.xlu1 %v1106_v41, %s4457_s20  ;;  %1431 = vrot.lane.b32.xlu0 %v1426_v42, %s4462_s21 }
  0xe9   : > { %1049 = vrot.lane.b32.xlu1 %v1046_v43, %s4463_s22 }
  0xed   : > { %989 = vrot.lane.b32.xlu1 %v986_v44, %s4464_s0 }
  0xf1   : > { %1433 = vrot.lane.b32.xlu1 %v1430_v45, %s4462_s21 }
 0x106   : > { %v822_v46 = vpop.permute.xlu0 %821 }
 0x10a   : > { %v826_v47 = vpop.permute.xlu1 %825  ;;  %v786_v49 = vpop.permute.xlu0 %785 }
 0x10e   : > { %v782_v50 = vpop.permute.xlu1 %781  ;;  %v742_v51 = vpop.permute.xlu0 %741 }
 0x112   : > { %v746_v52 = vpop.permute.xlu1 %745  ;;  %v706_v53 = vpop.permute.xlu0 %705 }
 0x116   : > { %v642_v54 = vpop.permute.xlu0 %641  ;;  %v702_v55 = vpop.permute.xlu1 %701 }
 0x11a   : > { %v604_v56 = vpop.permute.xlu0 %603  ;;  %v646_v57 = vpop.permute.xlu1 %645 }
 0x11e   : > { %v558_v58 = vpop.permute.xlu0 %557  ;;  %v600_v59 = vpop.permute.xlu1 %599 }
 0x122   : > { %v824_v60 = vpop.permute.xlu0 %823  ;;  %v562_v61 = vpop.permute.xlu1 %561 }
 0x123   : > { %v827_v62 = vsel %vm504_vm7, %v822_v46, %v824_v60  ;;  %v828_v63 = vsel %vm504_vm7, %v824_v60, %v826_v47 }
 0x124   : > { %874 = vmatprep.subr.mxu0 %v828_v63 }
 0x125   : > { %875 = vmatpush1.msra.mxu0 %v827_v62 }
 0x126   : > { %v744_v1 = vpop.permute.xlu0 %743  ;;  %v784_v2 = vpop.permute.xlu1 %783 }
 0x127   : > { %v787_v6 = vsel %vm546_vm6, %v782_v50, %v784_v2  ;;  %v788_v7 = vsel %vm546_vm6, %v784_v2, %v786_v49  ;;  %v748_v9 = vsel %vm588_vm5, %v744_v1, %v746_v52  ;;  %v747_v11 = vsel %vm588_vm5, %v742_v51, %v744_v1 }
 0x128   : > { %876 = vmatprep.subr.mxu0 %v788_v7 }
 0x129   : > { %877 = vmatpush1.msra.mxu0 %v787_v6 }
 0x12a   : > { %v704_v12 = vpop.permute.xlu1 %703  ;;  %v644_v13 = vpop.permute.xlu0 %643  ;;  %878 = vmatprep.subr.mxu0 %v748_v9 }
 0x12b   : > { %v707_v15 = vsel %vm630_vm4, %v702_v55, %v704_v12  ;;  %v708_v16 = vsel %vm630_vm4, %v704_v12, %v706_v53  ;;  %879 = vmatpush1.msra.mxu0 %v747_v11  ;;  %v649_v22 = vsel %vm647_vm3, %v644_v13, %v646_v57  ;;  %v648_v23 = vsel %vm647_vm3, %v642_v54, %v644_v13 }
 0x12c   : > { %880 = vmatprep.subr.mxu0 %v708_v16 }
 0x12d   : > { %881 = vmatpush1.msra.mxu0 %v707_v15  ;;  %v1220_v15 = vrot.slane %v3025_v8, %v3535_v4 }
 0x12e   : > { %v602_v20 = vpop.permute.xlu1 %601  ;;  %v560_v21 = vpop.permute.xlu0 %559  ;;  %882 = vmatprep.subr.mxu0 %v670_v14  ;;  %v1224_v14 = vrot.slane %v3025_v8, %v3537_v5  ;;  %v1640_v8 = vld [vmem:[%s4413_s3 + $0x70] sm:$0xff] }
 0x12f   : > { %883 = vmatpush1.msra.mxu0 %v669_v17  ;;  %v607_v48 = vsel %vm605_vm2, %v602_v20, %v604_v56  ;;  %v606_v24 = vsel %vm605_vm2, %v600_v59, %v602_v20  ;;  %v565_v28 = vsel %vm563_vm1, %v560_v21, %v562_v61  ;;  %v564_v27 = vsel %vm563_vm1, %v558_v58, %v560_v21 }
 0x130   : > { %884 = vmatprep.subr.mxu0 %v649_v22 }
 0x131   : > { %885 = vmatpush1.msra.mxu0 %v648_v23 }
 0x132   : > { %v520_v25 = vpop.permute.xlu0 %519  ;;  %v518_v26 = vpop.permute.xlu1 %517  ;;  %886 = vmatprep.subr.mxu0 %v607_v48 }
 0x133   : > { %887 = vmatpush1.msra.mxu0 %v606_v24  ;;  %v523_v29 = vsel %vm521_vm0, %v518_v26, %v520_v25 }
 0x134   : > { %888 = vmatprep.subr.mxu0 %v565_v28 }
 0x135   : > { %889 = vmatpush1.msra.mxu0 %v564_v27 }
 0x136   : > { %v516_v30 = vpop.permute.xlu1 %515  ;;  %890 = vmatprep.subr.mxu0 %v523_v29 }
 0x137   : > { %v522_v32 = vsel %vm521_vm0, %v516_v30, %v518_v26 }
 0x138   : > { %891 = vmatpush1.msra.mxu0 %v522_v32 }
 0x139   : > { %3020 = vmatmul.mubr.msk.f32.vlgmr.msra.gmra.mxu0 %vm853_vm8, %v833_v31 }
 0x13a   : > { %930 = vmatprep.mubr.f32.mxu0 %v3388_v10 }
 0x13d   : > { %3021 = vmatmul.mubr.msk.f32.gmra.mxu0 %vm853_vm8, %v834_v33 }
 0x13f   : > { %v945_v34 = vpop.permute.xlu0 %944 }
 0x143   : > { %v940_v35 = vpop.permute.xlu1 %939 }
 0x144   : > { %v953_v36 = vpop.permute.xlu0 %952 }
 0x148   : > { %v957_v37 = vpop.permute.xlu1 %956  ;;  %v3750_v38 = vpop.permute.xlu0 %1311 }
 0x14c   : > { %v3752_v39 = vpop.permute.xlu1 %1371  ;;  %v3756_v41 = vpop.permute.xlu0 %1251 }
 0x150   : > { %v3754_v40 = vpop.permute.xlu1 %1373  ;;  %v1168_v44 = vpop.permute.xlu0 %1167 }
 0x151   : > { %v1381_v42 = vmul.f32 0.0, %v3754_v40  ;;  %v1175_v47 = vmul.f32 0.0, %v1168_v44  ;;  %v1375_v32 = vsel %vm563_vm1, %v3752_v39, %v3754_v40 }
 0x153   : > { %1395 = vrot.lane.b32.xlu0 %v1381_v42, %s4463_s22  ;;  %1401 = vrot.lane.b32.xlu1 %v1381_v42, %s4463_s22 }
 0x154   : > { %v3761_v10 = vpop.permute.xlu1 %1313  ;;  %v1108_v49 = vpop.permute.xlu0 %1107 }
 0x155   : > { %v1321_v43 = vmul.f32 0.0, %v3761_v10  ;;  %v1115_v50 = vmul.f32 0.0, %v1108_v49 }
 0x157   : > { %1335 = vrot.lane.b32.xlu0 %v1321_v43, %s4457_s20  ;;  %1341 = vrot.lane.b32.xlu1 %v1321_v43, %s4457_s20 }
 0x158   : > { %v3766_v45 = vpop.permute.xlu1 %1253  ;;  %v1048_v51 = vpop.permute.xlu0 %1047 }
 0x159   : > { %v1261_v46 = vmul.f32 0.0, %v3766_v45  ;;  %v3773_v52 = vmul.f32 0.0, %v1048_v51 }
 0x15b   : > { %1275 = vrot.lane.b32.xlu0 %v1261_v46, %s4458_s28  ;;  %1281 = vrot.lane.b32.xlu1 %v1261_v46, %s4458_s28 }
 0x15c   : > { %v3781_v63 = vpop.permute.xlu1 %1169  ;;  %v988_v42 = vpop.permute.xlu0 %987 }
 0x15d   : > { %v1171_v23 = vsel %vm630_vm4, %v1168_v44, %v3781_v63  ;;  %v995_v46 = vmul.f32 0.0, %v988_v42 }
 0x15f   : > { %1193 = vrot.lane.b32.xlu0 %v1175_v47, %s4459_s25  ;;  %1187 = vrot.lane.b32.xlu1 %v1175_v47, %s4459_s25 }
 0x160   : > { %v3800_v13 = vpop.permute.xlu1 %1109 }
 0x161   : > { %v1111_v25 = vsel %vm588_vm5, %v1108_v49, %v3800_v13 }
 0x163   : > { %1133 = vrot.lane.b32.xlu0 %v1115_v50, %s4460_s26  ;;  %1127 = vrot.lane.b32.xlu1 %v1115_v50, %s4460_s26 }
 0x164   : > { %v1050_v26 = vpop.permute.xlu1 %1049 }
 0x165   : > { %v1051_v27 = vsel %vm546_vm6, %v1048_v51, %v1050_v26 }
 0x167   : > { %1073 = vrot.lane.b32.xlu0 %v3773_v52, %s4461_s27 }
 0x1f9   : > { %v926_v53 = vpop.f32.mrf.mxu0 }
 0x1fa   : > { %v947_v54 = vmul.f32 %v940_v35, %v926_v53 }
 0x1fb   : > { %v928_v55 = vpop.f32.mrf.mxu0 }
 0x1fc   : > { %v959_v56 = vadd.f32 %v953_v36, %v947_v54  ;;  %v948_v57 = vmul.f32 %v940_v35, %v928_v55  ;;  %v1315_v35 = vsel %vm605_vm2, %v3750_v38, %v3761_v10  ;;  %v990_v10 = vpop.permute.xlu1 %989 }
 0x1fd   : > { %v932_v58 = vpop.f32.mrf.mxu0  ;;  %v991_v43 = vsel %vm504_vm7, %v988_v42, %v990_v10 }
 0x1fe   : > { %v3779_v59 = vmax.f32 %v959_v56, 0.0  ;;  %v960_v60 = vadd.f32 %v953_v36, %v948_v57  ;;  %v949_v61 = vmul.f32 %v945_v34, %v932_v58  ;;  %v1432_v56 = vpop.permute.xlu0 %1431  ;;  %v1476_v58 = vld [vmem:[%s4420_s10 + $0x8] sm:$0xff] }
 0x1ff   : > { %v934_v62 = vpop.f32.mrf.mxu0  ;;  %3030 = vmatprep.mubr.msk.f32.mxu1 %vm563_vm1, %v1476_v58 }
 0x200   : > { %v3783_v0 = vmax.f32 %v960_v60, 0.0  ;;  %v950_v1 = vmul.f32 %v945_v34, %v934_v62  ;;  %v961_v2 = vadd.f32 %v957_v37, %v949_v61  ;;  %v1379_v3 = vmul.f32 %v3752_v39, %v3779_v59  ;;  %v1434_v47 = vpop.permute.xlu1 %1433 }
 0x201   : > { %v1319_v12 = vmul.f32 %v3750_v38, %v3779_v59  ;;  %v1259_v17 = vmul.f32 %v3756_v41, %v3779_v59  ;;  %v3820_v4 = vmul.f32 %v1220_v15, %v3779_v59  ;;  %v1176_v48 = vmul.f32 %v1171_v23, %v3779_v59 }
 0x202   : > { %v962_v6 = vadd.f32 %v957_v37, %v950_v1  ;;  %1391 = vrot.lane.b32.xlu1 %v1379_v3, %s4463_s22  ;;  %v1177_v7 = vmul.f32 %v3781_v63, %v3783_v0  ;;  %v3793_v9 = vmax.f32 %v961_v2, 0.0  ;;  %v1117_v16 = vmul.f32 %v3800_v13, %v3783_v0  ;;  %v1641_v1 = vld [vmem:[%s4413_s3 + $0x78] sm:$0xff] }
 0x203   : > { %v3817_v5 = vmul.f32 %v1224_v14, %v3783_v0  ;;  %1231 = vst [vmem:[#allocation4 + $0x80] sm:$0xff] %v3820_v4  ;;  %v1116_v28 = vmul.f32 %v1111_v25, %v3779_v59  ;;  %v1056_v30 = vmul.f32 %v1051_v27, %v3779_v59  ;;  %v1380_v33 = vmul.f32 %v1375_v32, %v3783_v0 }
 0x204   : > { %v3795_v11 = vmax.f32 %v962_v6, 0.0  ;;  %1191 = vrot.lane.b32.xlu0 %v1177_v7, %s4459_s25  ;;  %v3814_v21 = vmul.f32 %v1220_v15, %v3793_v9  ;;  %v1382_v22 = vmul.f32 %v3752_v39, %v3793_v9  ;;  %v1322_v24 = vmul.f32 %v3750_v38, %v3793_v9  ;;  %v1656_v6 = vld [vmem:[%s4413_s3 + $0xf0] sm:$0xff] }
 0x205   : > { %v1262_v29 = vmul.f32 %v3756_v41, %v3793_v9  ;;  %v1179_v31 = vmul.f32 %v1171_v23, %v3793_v9  ;;  %v1119_v34 = vmul.f32 %v1111_v25, %v3793_v9  ;;  %v1320_v36 = vmul.f32 %v1315_v35, %v3783_v0  ;;  %v1652_v15 = vld [vmem:[%s4413_s3 + $0xd0] sm:$0xff]  ;;  %v1650_v23 = vld [vmem:[%s4413_s3 + $0xc0] sm:$0xff]  ;;  %v1633_v25 = vld [vmem:[%s4413_s3 + $0x38] sm:$0xff] }
 0x206   : > { %1331 = vrot.lane.b32.xlu1 %v1319_v12, %s4457_s20  ;;  %v3811_v20 = vmul.f32 %v1224_v14, %v3795_v11  ;;  %1233 = vst [vmem:[#allocation4 + $0x90] sm:$0xff] %v3814_v21  ;;  %v1059_v37 = vmul.f32 %v1051_v27, %v3793_v9  ;;  %v1255_v39 = vsel %vm647_vm3, %v3756_v41, %v3766_v45  ;;  %v1441_v49 = vmul.f32 0.0, %v1434_v47  ;;  %v1654_v12 = vld [vmem:[%s4413_s3 + $0xe0] sm:$0xff]  ;;  %v1653_v14 = vld [vmem:[%s4413_s3 + $0xd8] sm:$0xff]  ;;  %v1402_v27 = vpop.permute.xlu1 %1401 }
 0x207   : > { %v1260_v40 = vmul.f32 %v1255_v39, %v3783_v0  ;;  %v1383_v38 = vmul.f32 %v1375_v32, %v3795_v11  ;;  %v1323_v44 = vmul.f32 %v1315_v35, %v3795_v11  ;;  %v996_v41 = vmul.f32 %v991_v43, %v3779_v59 }
 0x208   : > { %1131 = vrot.lane.b32.xlu0 %v1117_v16, %s4460_s26  ;;  %v1263_v45 = vmul.f32 %v1255_v39, %v3795_v11  ;;  %v1057_v50 = vmul.f32 %v1050_v26, %v3783_v0  ;;  %v999_v51 = vmul.f32 %v991_v43, %v3793_v9  ;;  %v1120_v53 = vmul.f32 %v3800_v13, %v3795_v11  ;;  %v1638_v13 = vld [vmem:[%s4413_s3 + $0x60] sm:$0xff]  ;;  %v1636_v16 = vld [vmem:[%s4413_s3 + $0x50] sm:$0xff] }
 0x209   : > { %v997_v54 = vmul.f32 %v990_v10, %v3783_v0  ;;  %v1060_v55 = vmul.f32 %v1050_v26, %v3795_v11  ;;  %v1442_v57 = vmul.f32 %v1432_v56, %v3793_v9  ;;  %v1000_v60 = vmul.f32 %v990_v10, %v3795_v11  ;;  %v1639_v9 = vld [vmem:[%s4413_s3 + $0x68] sm:$0xff]  ;;  %v1648_v26 = vld [vmem:[%s4413_s3 + $0xb0] sm:$0xff] }
 0x20a   : > { %1271 = vrot.lane.b32.xlu1 %v1259_v17, %s4458_s28  ;;  %v1435_v61 = vsel %vm521_vm0, %v1432_v56, %v1434_v47  ;;  %v3391_v3 = vmov 3   ;;  %v3392_v7 = vmov 2   ;;  %v1651_v17 = vld [vmem:[%s4413_s3 + $0xc8] sm:$0xff]  ;;  %v1342_v32 = vpop.permute.xlu1 %1341 }
 0x20b   : > { %v1443_v62 = vmul.f32 %v1435_v61, %v3795_v11  ;;  %v1440_v2 = vmul.f32 %v1435_v61, %v3783_v0  ;;  %3278 = vset.pattern.permute.xlu1 %v3391_v3  ;;  %3277 = vset.pattern.permute.xlu0 %v3392_v7  ;;  %v1655_v0 = vld [vmem:[%s4413_s3 + $0xe8] sm:$0xff] }
 0x20c   : > { %1397 = vrot.lane.b32.xlu0 %v1382_v22, %s4463_s22  ;;  %v1635_v22 = vld [vmem:[%s4413_s3 + $0x48] sm:$0xff] }
 0x20e   : > { %1189 = vrot.lane.b32.xlu1 %v1176_v48, %s4459_s25  ;;  %v1396_v48 = vpop.permute.xlu0 %1395 }
 0x210   : > { %1337 = vrot.lane.b32.xlu0 %v1322_v24, %s4457_s20  ;;  %v1649_v24 = vld [vmem:[%s4413_s3 + $0xb8] sm:$0xff] }
 0x212   : > { %1129 = vrot.lane.b32.xlu1 %v1116_v28, %s4460_s26  ;;  %v1632_v28 = vld [vmem:[%s4413_s3 + $0x30] sm:$0xff] }
 0x214   : > { %1277 = vrot.lane.b32.xlu0 %v1262_v29, %s4458_s28  ;;  %v1631_v29 = vld [vmem:[%s4413_s3 + $0x28] sm:$0xff] }
 0x216   : > { %1069 = vrot.lane.b32.xlu1 %v1056_v30, %s4461_s27  ;;  %v1336_v30 = vpop.permute.xlu0 %1335 }
 0x218   : > { %1195 = vrot.lane.b32.xlu0 %v1179_v31, %s4459_s25  ;;  %v1646_v31 = vld [vmem:[%s4413_s3 + $0xa0] sm:$0xff] }
 0x21a   : > { %1393 = vrot.lane.b32.xlu1 %v1380_v33, %s4463_s22  ;;  %v1276_v33 = vpop.permute.xlu0 %1275 }
 0x21c   : > { %1135 = vrot.lane.b32.xlu0 %v1119_v34, %s4460_s26  ;;  %v3983_v34 = vpop.permute.xlu1 %1281 }
 0x21e   : > { %1333 = vrot.lane.b32.xlu1 %v1320_v36, %s4457_s20  ;;  %v1194_v35 = vpop.permute.xlu0 %1193 }
 0x220   : > { %1075 = vrot.lane.b32.xlu0 %v1059_v37, %s4461_s27  ;;  %v1188_v36 = vpop.permute.xlu1 %1187 }
 0x222   : > { %1273 = vrot.lane.b32.xlu1 %v1260_v40, %s4458_s28  ;;  %v1134_v37 = vpop.permute.xlu0 %1133 }
 0x224   : > { %1399 = vrot.lane.b32.xlu0 %v1383_v38, %s4463_s22  ;;  %v1128_v39 = vpop.permute.xlu1 %1127 }
 0x226   : > { %1067 = vrot.lane.b32.xlu1 %v3773_v52, %s4461_s27  ;;  %v1180_v52 = vmul.f32 %v3781_v63, %v3795_v11  ;;  %v1657_v63 = vld [vmem:[%s4413_s3 + $0xf8] sm:$0xff]  ;;  %v1439_v11 = vmul.f32 %v1432_v56, %v3779_v59  ;;  %v1074_v40 = vpop.permute.xlu0 %1073 }
 0x227   : > { %3067 = vmatprep.subr.mxu0 %v1657_v63  ;;  %v1637_v59 = vld [vmem:[%s4413_s3 + $0x58] sm:$0xff] }
 0x228   : > { %1339 = vrot.lane.b32.xlu0 %v1323_v44, %s4457_s20  ;;  %3068 = vmatpush3.msra.mxu0 %v1641_v1  ;;  %s3066_s20 = sshll.u32 %s3502_s17, 8 }
 0x229   : > { %3069 = vmatprep.subr.mxu0 %v1656_v6 }
 0x22a   : > { %1009 = vrot.lane.b32.xlu1 %v996_v41, %s4462_s21  ;;  %3070 = vmatpush3.msra.mxu0 %v1640_v8 }
 0x22b   : > { %3071 = vmatprep.subr.mxu0 %v1655_v0 }
 0x22c   : > { %1279 = vrot.lane.b32.xlu0 %v1263_v45, %s4458_s28  ;;  %3072 = vmatpush3.msra.mxu0 %v1639_v9 }
 0x22d   : > { %3073 = vmatprep.subr.mxu0 %v1654_v12 }
 0x22e   : > { %1007 = vrot.lane.b32.xlu1 %v995_v46, %s4462_s21  ;;  %3074 = vmatpush3.msra.mxu0 %v1638_v13 }
 0x22f   : > { %3075 = vmatprep.subr.mxu0 %v1653_v14 }
 0x230   : > { %1071 = vrot.lane.b32.xlu0 %v1057_v50, %s4461_s27  ;;  %3076 = vmatpush3.msra.mxu0 %v1637_v59 }
 0x231   : > { %3077 = vmatprep.subr.mxu0 %v1652_v15 }
 0x232   : > { %1461 = vrot.lane.b32.xlu1 %v1441_v49, %s4464_s0  ;;  %3078 = vmatpush3.msra.mxu0 %v1636_v16 }
 0x233   : > { %3079 = vmatprep.subr.mxu0 %v1651_v17 }
 0x234   : > { %1015 = vrot.lane.b32.xlu0 %v999_v51, %s4462_s21  ;;  %3080 = vmatpush3.msra.mxu0 %v1635_v22 }
 0x235   : > { %3081 = vmatprep.subr.mxu0 %v1650_v23 }
 0x236   : > { %1197 = vrot.lane.b32.xlu1 %v1180_v52, %s4459_s25 }
 0x238   : > { %1013 = vrot.lane.b32.xlu0 %v995_v46, %s4462_s21 }
 0x23a   : > { %1137 = vrot.lane.b32.xlu1 %v1120_v53, %s4460_s26  ;;  %s4446_s26 = smov 8  }
 0x23c   : > { %1011 = vrot.lane.b32.xlu0 %v997_v54, %s4462_s21 }
 0x23e   : > { %1077 = vrot.lane.b32.xlu1 %v1060_v55, %s4461_s27  ;;  %s4366_s27 = scalar_lea.hbm %s4424_s14, %s3066_s20 }
 0x240   : > { %1457 = vrot.lane.b32.xlu0 %v1442_v57, %s4464_s0 }
 0x242   : > { %1017 = vrot.lane.b32.xlu1 %v1000_v60, %s4462_s21 }
 0x244   : > { %1459 = vrot.lane.b32.xlu0 %v1443_v62, %s4464_s0 }
 0x246   : > { %1453 = vrot.lane.b32.xlu1 %v1440_v2, %s4464_s0 }
 0x248   : > { %1455 = vrot.lane.b32.xlu0 %v1441_v49, %s4464_s0 }
 0x24a   : > { %1451 = vrot.lane.b32.xlu1 %v1439_v11, %s4464_s0  ;;  %s3394_s0 = smov 120  }
 0x24c   : > { %1599 = vperm.xlu0 %3277, %v3659_v19  }
 0x24e   : > { %1611 = vperm.xlu1 %3278, %v3659_v19   ;;  %v1634_v19 = vld [vmem:[%s4413_s3 + $0x40] sm:$0xff] }
 0x24f   : > { %3082 = vmatpush3.msra.mxu0 %v1634_v19 }
 0x250   : > { %3280 = vset.pattern.permute.xlu0 %v3391_v3  ;;  %3083 = vmatprep.subr.mxu0 %v1649_v24 }
 0x251   : > { %1615 = vperm.xlu0 %3280, %v3652_v18   ;;  %3084 = vmatpush3.msra.mxu0 %v1633_v25 }
 0x252   : > { %3279 = vset.pattern.permute.xlu1 %v3392_v7  ;;  %3085 = vmatprep.subr.mxu0 %v1648_v26 }
 0x253   : > { %1603 = vperm.xlu1 %3279, %v3652_v18   ;;  %v1647_v18 = vld [vmem:[%s4413_s3 + $0xa8] sm:$0xff]  ;;  %3086 = vmatpush3.msra.mxu0 %v1632_v28 }
 0x254   : > { %3087 = vmatprep.subr.mxu0 %v1647_v18 }
 0x255   : > { %3088 = vmatpush3.msra.mxu0 %v1631_v29 }
 0x256   : > { %3089 = vmatprep.subr.mxu0 %v1646_v31 }
 0x274   : > { %v1392_v38 = vpop.permute.xlu1 %1391 }
 0x276   : > { %v1192_v42 = vpop.permute.xlu0 %1191 }
 0x278   : > { %v1332_v10 = vpop.permute.xlu1 %1331 }
 0x27a   : > { %v1132_v43 = vpop.permute.xlu0 %1131 }
 0x27c   : > { %v1272_v44 = vpop.permute.xlu1 %1271 }
 0x27e   : > { %v1398_v41 = vpop.permute.xlu0 %1397 }
 0x280   : > { %v1190_v45 = vpop.permute.xlu1 %1189 }
 0x281   : > { %v3986_v46 = vsel %vm647_vm3, %v1188_v36, %v1190_v45  ;;  %v3989_v47 = vsel %vm647_vm3, %v1190_v45, %v1192_v42  ;;  %v1478_v45 = vld [vmem:[%s4420_s10 + $0x18] sm:$0xff] }
 0x282   : > { %1207 = vst [vmem:[#allocation4 + $0x60] sm:$0xff] %v3986_v46  ;;  %v1338_v49 = vpop.permute.xlu0 %1337 }
 0x284   : > { %v1130_v50 = vpop.permute.xlu1 %1129 }
 0x285   : > { %v3993_v51 = vsel %vm605_vm2, %v1128_v39, %v1130_v50  ;;  %v3996_v52 = vsel %vm605_vm2, %v1130_v50, %v1132_v43  ;;  %v1629_v50 = vld [vmem:[%s4413_s3 + $0x18] sm:$0xff] }
 0x286   : > { %1147 = vst [vmem:[#allocation4 + $0x40] sm:$0xff] %v3993_v51  ;;  %v1278_v53 = vpop.permute.xlu0 %1277 }
 0x288   : > { %v1070_v54 = vpop.permute.xlu1 %1069 }
 0x28a   : > { %v1196_v55 = vpop.permute.xlu0 %1195 }
 0x28b   : > { %v4000_v56 = vsel %vm647_vm3, %v1194_v35, %v1196_v55 }
 0x28c   : > { %1209 = vst [vmem:[#allocation4 + $0x70] sm:$0xff] %v4000_v56  ;;  %v1394_v57 = vpop.permute.xlu1 %1393 }
 0x28d   : > { %v1403_v58 = vsel %vm546_vm6, %v1392_v38, %v1394_v57  ;;  %v1404_v60 = vsel %vm546_vm6, %v1394_v57, %v1396_v48  ;;  %v1740_v57 = vld [vmem:[%s4414_s4 + $0x38] sm:$0xff] }
 0x28e   : > { %1411 = vst [vmem:[#allocation4 + $0xe0] sm:$0xff] %v1403_v58  ;;  %v4005_v61 = vpop.permute.xlu0 %1135 }
 0x28f   : > { %v4009_v62 = vsel %vm605_vm2, %v1134_v37, %v4005_v61 }
 0x290   : > { %1149 = vst [vmem:[#allocation4 + $0x50] sm:$0xff] %v4009_v62  ;;  %v1334_v63 = vpop.permute.xlu1 %1333 }
 0x291   : > { %v1343_v1 = vsel %vm588_vm5, %v1332_v10, %v1334_v63  ;;  %v1344_v2 = vsel %vm588_vm5, %v1334_v63, %v1336_v30 }
 0x292   : > { %1351 = vst [vmem:[#allocation4 + $0xc0] sm:$0xff] %v1343_v1  ;;  %v4014_v3 = vpop.permute.xlu0 %1075 }
 0x293   : > { %v4018_v6 = vsel %vm563_vm1, %v1074_v40, %v4014_v3 }
 0x294   : > { %1089 = vst [vmem:[#allocation4 + $0x30] sm:$0xff] %v4018_v6  ;;  %v1274_v7 = vpop.permute.xlu1 %1273 }
 0x295   : > { %v1283_v8 = vsel %vm630_vm4, %v1272_v44, %v1274_v7  ;;  %v1284_v0 = vsel %vm630_vm4, %v1274_v7, %v1276_v33  ;;  %v1475_v44 = vld [vmem:[%s4420_s10] sm:$0xff] }
 0x296   : > { %1291 = vst [vmem:[#allocation4 + $0xa0] sm:$0xff] %v1283_v8  ;;  %v1400_v9 = vpop.permute.xlu0 %1399 }
 0x297   : > { %v1405_v11 = vsel %vm546_vm6, %v1398_v41, %v1400_v9  ;;  %v1406_v12 = vsel %vm546_vm6, %v1400_v9, %v1402_v27 }
 0x298   : > { %1413 = vst [vmem:[#allocation4 + $0xf0] sm:$0xff] %v1405_v11  ;;  %v1068_v13 = vpop.permute.xlu1 %1067  ;;  %1521 = vmatprep.subr.mxu1 %v1406_v12 }
 0x299   : > { %v1079_v14 = vsel %vm563_vm1, %v1068_v13, %v1070_v54  ;;  %1522 = vmatpush1.msra.mxu1 %v1405_v11 }
 0x29a   : > { %1087 = vst [vmem:[#allocation4 + $0x20] sm:$0xff] %v1079_v14  ;;  %v1340_v59 = vpop.permute.xlu0 %1339  ;;  %1523 = vmatprep.subr.mxu1 %v1404_v60  ;;  %v1738_v60 = vld [vmem:[%s4414_s4 + $0x28] sm:$0xff] }
 0x29b   : > { %v1345_v15 = vsel %vm588_vm5, %v1338_v49, %v1340_v59  ;;  %v1346_v16 = vsel %vm588_vm5, %v1340_v59, %v1342_v32  ;;  %1524 = vmatpush1.msra.mxu1 %v1403_v58  ;;  %v1645_v49 = vld [vmem:[%s4413_s3 + $0x98] sm:$0xff]  ;;  %v1739_v58 = vld [vmem:[%s4414_s4 + $0x30] sm:$0xff] }
 0x29c   : > { %1353 = vst [vmem:[#allocation4 + $0xd0] sm:$0xff] %v1345_v15  ;;  %v1010_v17 = vpop.permute.xlu1 %1009  ;;  %1525 = vmatprep.subr.mxu1 %v1346_v16 }
 0x29d   : > { %1526 = vmatpush1.msra.mxu1 %v1345_v15 }
 0x29e   : > { %v1280_v22 = vpop.permute.xlu0 %1279  ;;  %1527 = vmatprep.subr.mxu1 %v1344_v2 }
 0x29f   : > { %v1285_v23 = vsel %vm630_vm4, %v1278_v53, %v1280_v22  ;;  %v1286_v19 = vsel %vm630_vm4, %v1280_v22, %v3983_v34  ;;  %1528 = vmatpush1.msra.mxu1 %v1343_v1  ;;  %v1643_v53 = vld [vmem:[%s4413_s3 + $0x88] sm:$0xff] }
 0x2a0   : > { %1293 = vst [vmem:[#allocation4 + $0xb0] sm:$0xff] %v1285_v23  ;;  %v1008_v48 = vpop.permute.xlu1 %1007  ;;  %1529 = vmatprep.subr.mxu1 %v1286_v19 }
 0x2a1   : > { %v1019_v24 = vsel %vm521_vm0, %v1008_v48, %v1010_v17  ;;  %1530 = vmatpush1.msra.mxu1 %v1285_v23  ;;  %v1736_v48 = vld [vmem:[%s4414_s4 + $0x18] sm:$0xff] }
 0x2a2   : > { %1027 = vst [vmem:[#allocation4] sm:$0xff] %v1019_v24  ;;  %v1072_v25 = vpop.permute.xlu0 %1071  ;;  %1531 = vmatprep.subr.mxu1 %v1284_v0 }
 0x2a3   : > { %v1080_v26 = vsel %vm563_vm1, %v1070_v54, %v1072_v25  ;;  %1532 = vmatpush1.msra.mxu1 %v1283_v8  ;;  %v1627_v54 = vld [vmem:[%s4413_s3 + $0x8] sm:$0xff] }
 0x2a4   : > { %v1462_v28 = vpop.permute.xlu1 %1461  ;;  %1533 = vmatprep.subr.mxu1 %v3811_v20  ;;  %v1734_v25 = vld [vmem:[%s4414_s4 + $0x8] sm:$0xff] }
 0x2a5   : > { %1534 = vmatpush1.msra.mxu1 %v3814_v21 }
 0x2a6   : > { %v1016_v27 = vpop.permute.xlu0 %1015  ;;  %1535 = vmatprep.subr.mxu1 %v3817_v5 }
 0x2a7   : > { %1536 = vmatpush1.msra.mxu1 %v3820_v4 }
 0x2a8   : > { %v1198_v18 = vpop.permute.xlu1 %1197 }
 0x2a9   : > { %v1202_v29 = vsel %vm647_vm3, %v1196_v55, %v1198_v18  ;;  %v1642_v55 = vld [vmem:[%s4413_s3 + $0x80] sm:$0xff] }
 0x2aa   : > { %v1014_v30 = vpop.permute.xlu0 %1013  ;;  %1537 = vmatprep.subr.mxu1 %v1202_v29 }
 0x2ab   : > { %v1021_v31 = vsel %vm521_vm0, %v1014_v30, %v1016_v27  ;;  %1538 = vmatpush1.msra.mxu1 %v4000_v56  ;;  %v1626_v56 = vld [vmem:[%s4413_s3] sm:$0xff] }
 0x2ac   : > { %1029 = vst [vmem:[#allocation4 + $0x10] sm:$0xff] %v1021_v31  ;;  %v1138_v32 = vpop.permute.xlu1 %1137  ;;  %1539 = vmatprep.subr.mxu1 %v3989_v47  ;;  %v1630_v47 = vld [vmem:[%s4413_s3 + $0x20] sm:$0xff] }
 0x2ad   : > { %v1142_v20 = vsel %vm605_vm2, %v4005_v61, %v1138_v32  ;;  %1540 = vmatpush1.msra.mxu1 %v3986_v46  ;;  %v1477_v46 = vld [vmem:[%s4420_s10 + $0x10] sm:$0xff]  ;;  %3090 = vmatpush3.msra.mxu0 %v1630_v47  ;;  %v4102_v61 = vld [vmem:[#allocation3] sm:$0xff] }
 0x2ae   : > { %v1012_v21 = vpop.permute.xlu0 %1011  ;;  %1541 = vmatprep.subr.mxu1 %v1142_v20  ;;  %3091 = vmatprep.subr.mxu0 %v1645_v49  ;;  %v3046_v32 = vld [vmem:[%s4412_s2 + $0x4] ss:$0 sm:$0xff] }
 0x2af   : > { %v1020_v5 = vsel %vm521_vm0, %v1010_v17, %v1012_v21  ;;  %1542 = vmatpush1.msra.mxu1 %v4009_v62  ;;  %3092 = vmatpush3.msra.mxu0 %v1629_v50  ;;  %v1737_v62 = vld [vmem:[%s4414_s4 + $0x20] sm:$0xff] }
 0x2b0   : > { %v1078_v4 = vpop.permute.xlu1 %1077  ;;  %1543 = vmatprep.subr.mxu1 %v3996_v52  ;;  %v1628_v52 = vld [vmem:[%s4413_s3 + $0x10] sm:$0xff] }
 0x2b1   : > { %v1082_v33 = vsel %vm563_vm1, %v4014_v3, %v1078_v4  ;;  %1544 = vmatpush1.msra.mxu1 %v3993_v51  ;;  %v1644_v51 = vld [vmem:[%s4413_s3 + $0x90] sm:$0xff] }
 0x2b2   : > { %v1458_v34 = vpop.permute.xlu0 %1457  ;;  %1545 = vmatprep.subr.mxu1 %v1082_v33  ;;  %3093 = vmatprep.subr.mxu0 %v1644_v51  ;;  %v1822_v33 = vld [vmem:[%s4422_s12] sm:$0xff] }
 0x2b3   : > { %1546 = vmatpush1.msra.mxu1 %v4018_v6  ;;  %3094 = vmatpush3.msra.mxu0 %v1628_v52 }
 0x2b4   : > { %v1018_v35 = vpop.permute.xlu1 %1017  ;;  %1547 = vmatprep.subr.mxu1 %v1080_v26  ;;  %3095 = vmatprep.subr.mxu0 %v1643_v53  ;;  %v1733_v26 = vld [vmem:[%s4414_s4] sm:$0xff] }
 0x2b5   : > { %v1022_v36 = vsel %vm521_vm0, %v1016_v27, %v1018_v35  ;;  %1548 = vmatpush1.msra.mxu1 %v1079_v14  ;;  %3096 = vmatpush3.msra.mxu0 %v1627_v54  ;;  %v4150_v35 = vld [vmem:[%s4423_s13] sm:$0xff] }
 0x2b6   : > { %v1460_v37 = vpop.permute.xlu0 %1459  ;;  %1549 = vmatprep.subr.mxu1 %v1022_v36  ;;  %3097 = vmatprep.subr.mxu0 %v1642_v55  ;;  %v4156_v36 = vld [vmem:[%s4423_s13 + $0x8] sm:$0xff]  ;;  %v2008_v53 = vld [vmem:[%s4416_s6] sm:$0xff] }
 0x2b7   : > { %v1465_v39 = vsel %vm504_vm7, %v1458_v34, %v1460_v37  ;;  %v1466_v40 = vsel %vm504_vm7, %v1460_v37, %v1462_v28  ;;  %1550 = vmatpush1.msra.mxu1 %v1021_v31  ;;  %3098 = vmatpush3.msra.mxu0 %v1626_v56  ;;  %v3393_v34 = vmov 4   ;;  %v3048_v56 = vld [vmem:[%s4412_s2 + $0x6] ss:$0 sm:$0xff] }
 0x2b8   : > { %1473 = vst [vmem:[#allocation4 + $0x110] sm:$0xff] %v1465_v39  ;;  %v1454_v38 = vpop.permute.xlu1 %1453  ;;  %1551 = vmatprep.subr.mxu1 %v1020_v5  ;;  %2426 = vmatprep.subr.mxu0 %v4102_v61 }
 0x2b9   : > { %1552 = vmatpush1.msra.mxu1 %v1019_v24  ;;  %v1735_v24 = vld [vmem:[%s4414_s4 + $0x10] sm:$0xff]  ;;  %3281 = vset.pattern.permute.xlu1 %v3393_v34 }
 0x2ba   : > { %v1456_v42 = vpop.permute.xlu0 %1455  ;;  %1581 = vmatprep.subr.mxu1 %v1466_v40  ;;  %1825 = vperm.xlu1 %3281, %v4150_v35   ;;  %v1823_v40 = vld [vmem:[%s4422_s12 + $0x8] sm:$0xff] }
 0x2bb   : > { %v1464_v10 = vsel %vm504_vm7, %v1454_v38, %v1456_v42  ;;  %1582 = vmatpush2.msra.mxu1 %v1465_v39 }
 0x2bc   : > { %v1452_v43 = vpop.permute.xlu1 %1451  ;;  %1583 = vmatprep.subr.mxu1 %v1464_v10 }
 0x2bd   : > { %v1463_v41 = vsel %vm504_vm7, %v1452_v43, %v1454_v38  ;;  %v1925_v38 = vld [vmem:[%s4415_s5] sm:$0xff] }
 0x2be   : > { %1471 = vst [vmem:[#allocation4 + $0x100] sm:$0xff] %v1463_v41  ;;  %1584 = vmatpush2.msra.mxu1 %v1463_v41  ;;  %1829 = vperm.xlu1 %3281, %v4156_v36  }
 0x2bf   : > { %1586 = vmatmul.mubr.f32.vlgmr.msra.gmra.mxu1 %v1475_v44  ;;  %3140 = vmatprep.subr.mxu1 %v1740_v57 }
 0x2c0   : > { %3031 = vmatprep.mubr.msk.f32.mxu1 %vm563_vm1, %v1478_v45  ;;  %3141 = vmatpush3.msra.mxu1 %v1740_v57  ;;  %v3049_v57 = vld [vmem:[%s4412_s2 + $0x7] ss:$0 sm:$0xff] }
 0x2c1   : > { %3142 = vmatprep.subr.mxu1 %v1739_v58 }
 0x2c2   : > { %3143 = vmatpush3.msra.mxu1 %v1739_v58  ;;  %v3045_v58 = vld [vmem:[%s4412_s2 + $0x3] ss:$0 sm:$0xff] }
 0x2c3   : > { %1592 = vmatmul.mubr.f32.gmra.mxu1 %v1477_v46  ;;  %3144 = vmatprep.subr.mxu1 %v1738_v60 }
 0x2c4   : > { %3145 = vmatpush3.msra.mxu1 %v1738_v60  ;;  %v3047_v60 = vld [vmem:[%s4412_s2 + $0x5] ss:$0 sm:$0xff] }
 0x2c5   : > { %3146 = vmatprep.subr.mxu1 %v1737_v62 }
 0x2c6   : > { %3147 = vmatpush3.msra.mxu1 %v1737_v62  ;;  %v3043_v62 = vld [vmem:[%s4412_s2 + $0x1] ss:$0 sm:$0xff] }
 0x2c7   : > { %v1600_v1 = vpop.permute.xlu0 %1599  ;;  %3148 = vmatprep.subr.mxu1 %v1736_v48 }
 0x2c8   : > { %3149 = vmatpush3.msra.mxu1 %v1736_v48 }
 0x2c9   : > { %v1612_v63 = vpop.permute.xlu1 %1611  ;;  %3150 = vmatprep.subr.mxu1 %v1735_v24 }
 0x2ca   : > { %3151 = vmatpush3.msra.mxu1 %v1735_v24 }
 0x2cb   : > { %3152 = vmatprep.subr.mxu1 %v1734_v25 }
 0x2cc   : > { %v1616_v13 = vpop.permute.xlu0 %1615  ;;  %3153 = vmatpush3.msra.mxu1 %v1734_v25 }
 0x2cd   : > { %3154 = vmatprep.subr.mxu1 %v1733_v26 }
 0x2ce   : > { %v1604_v7 = vpop.permute.xlu1 %1603  ;;  %3155 = vmatpush3.msra.mxu1 %v1733_v26 }
 0x335   : > { %v1826_v42 = vpop.permute.xlu1 %1825 }
 0x339   : > { %v1830_v10 = vpop.permute.xlu1 %1829 }
 0x37f   : > { %v1587_v2 = vpop.f32.mrf.mxu1 }
 0x380   : > { %v1606_v3 = vmul.f32 %v1600_v1, %v1587_v2  ;;  %v3042_v2 = vld [vmem:[%s4412_s2] ss:$0 sm:$0xff] }
 0x381   : > { %v1589_v6 = vpop.f32.mrf.mxu1 }
 0x382   : > { %v1607_v8 = vmul.f32 %v1600_v1, %v1589_v6  ;;  %v1618_v0 = vadd.f32 %v1612_v63, %v1606_v3  ;;  %v3050_v1 = vld [vmem:[%s4412_s2 + $0x8] ss:$0 sm:$0xff] }
 0x383   : > { %v1593_v9 = vpop.f32.mrf.mxu1 }
 0x384   : > { %v1619_v11 = vadd.f32 %v1612_v63, %v1607_v8  ;;  %v1608_v12 = vmul.f32 %v1604_v7, %v1593_v9  ;;  %v1622_v16 = vmax.f32 %v1618_v0, 0.0  ;;  %v3044_v63 = vld [vmem:[%s4412_s2 + $0x2] ss:$0 sm:$0xff] }
 0x385   : > { %v1595_v14 = vpop.f32.mrf.mxu1 }
 0x386   : > { %v1623_v59 = vmax.f32 %v1619_v11, 0.0  ;;  %v1609_v15 = vmul.f32 %v1604_v7, %v1595_v14  ;;  %v1620_v17 = vadd.f32 %v1616_v13, %v1608_v12 }
 0x388   : > { %v1621_v22 = vadd.f32 %v1616_v13, %v1609_v15  ;;  %1722 = vmatprep.mubr.f32.mxu0 %v1623_v59  ;;  %v1624_v19 = vmax.f32 %v1620_v17, 0.0 }
 0x389   : > { %1723 = vmatmul.mubr.f32.vlgmr.msra.gmra.mxu0 %v1622_v16 }
 0x38a   : > { %v1625_v23 = vmax.f32 %v1621_v22, 0.0 }
 0x38c   : > { %1727 = vmatprep.mubr.f32.mxu0 %v1625_v23 }
 0x38d   : > { %1728 = vmatmul.mubr.f32.gmra.mxu0 %v1624_v19 }
 0x449   : > { %v3099_v28 = vpop.f32.mrf.mxu0 }
 0x44b   : > { %v3100_v27 = vpop.f32.mrf.mxu0 }
 0x44c   : > { %v4120_v18 = vadd.f32 %v3100_v27, %v3099_v28 }
 0x44d   : > { %v3102_v29 = vpop.f32.mrf.mxu0 }
 0x44e   : > { %2143 = vst.msk [vmem:[#allocation3 + $0x8] sm:$0xff] %vm480_vm9, %v4120_v18  ;;  %3156 = vmatprep.mubr.msk.f32.mxu1 %vm480_vm9, %v4120_v18 }
 0x44f   : > { %v3103_v30 = vpop.f32.mrf.mxu0 }
 0x450   : > { %v4126_v31 = vadd.f32 %v3103_v30, %v3102_v29 }
 0x452   : > { %2144 = vst.msk [vmem:[#allocation3 + $0x20] sm:$0xff] %vm480_vm9, %v4126_v31  ;;  %3157 = vmatmul.mubr.msk.f32.vlgmr.msra.gmra.mxu1 %vm480_vm9, %v4126_v31 }
 0x453   : > { %3163 = vmatprep.mubr.msk.f32.mxu1 %vm563_vm1, %v1822_v33 }
 0x455   : > { %v4135_v20 = vld [vmem:[#allocation3 + $0x8] sm:$0xff] }
 0x456   : > { %v2294_v21 = vmul.f32 %v3046_v32, %v4135_v20 }
 0x458   : > { %2296 = vst.msk [vmem:[#allocation4 + $0x80] sm:$0xff] %vm480_vm9, %v2294_v21 }
 0x459   : > { %v4139_v5 = vld [vmem:[#allocation3 + $0x20] sm:$0xff] }
 0x45a   : > { %v2295_v4 = vmul.f32 %v3046_v32, %v4139_v5 }
 0x45c   : > { %2297 = vst.msk [vmem:[#allocation4 + $0x90] sm:$0xff] %vm480_vm9, %v2295_v4 }
 0x512   : > { %v3158_v37 = vpop.f32.mrf.mxu1 }
 0x513   : > { %3159 = vmatprep.subr.mxu1 %v3158_v37 }
 0x514   : > { %v1813_v39 = vpop.f32.mrf.mxu1  ;;  %3160 = vmatpush3.msra.mxu1 %v3158_v37  ;;  %v2391_v37 = vld [vmem:[%s4421_s11 + $0x8] sm:$0xff] }
 0x515   : > { %3161 = vmatprep.subr.mxu1 %v1813_v39  ;;  %3051 = vmatprep.mubr.msk.f32.mxu0 %vm563_vm1, %v2391_v37 }
 0x516   : > { %3162 = vmatpush3.msra.mxu1 %v1813_v39 }
 0x517   : > { %3164 = vmatmul.mubr.msk.f32.vlgmr.msra.gmra.mxu1 %vm563_vm1, %v1823_v40  ;;  %3166 = vmatprep.subr.mxu1 %v1925_v38 }
 0x518   : > { %3167 = vmatpush3.msra.mxu1 %v1925_v38 }
 0x519   : > { %3171 = vmatprep.subr.mxu1 %v2008_v53 }
 0x5d7   : > { %v3165_v43 = vpop.f32.mrf.mxu1 }
 0x5d8   : > { %v1910_v44 = vadd.f32 %v3165_v43, %v1830_v10 }
 0x5d9   : > { %v1904_v41 = vpop.f32.mrf.mxu1 }
 0x5da   : > { %v3037_v45 = vmul.f32 -1.442695, %v1910_v44  ;;  %v1905_v46 = vadd.f32 %v1904_v41, %v1826_v42 }
 0x5dc   : > { %3287 = vpow2.f32 %v3037_v45  ;;  %v3036_v47 = vmul.f32 -1.442695, %v1905_v46 }
 0x5de   : > { %3289 = vpow2.f32 %v3036_v47 }
 0x5e9   : > { %v3288_v49 = vpop.eup %3287 }
 0x5ea   : > { %v1920_v50 = vadd.f32 1.0, %v3288_v49 }
 0x5eb   : > { %v3290_v51 = vpop.eup %3289 }
 0x5ec   : > { %3291 = vrcp.f32 %v1920_v50  ;;  %v1919_v52 = vadd.f32 1.0, %v3290_v51 }
 0x5ee   : > { %3293 = vrcp.f32 %v1919_v52 }
 0x5f9   : > { %v3292_v54 = vpop.eup %3291 }
 0x5fa   : > { %2011 = vrot.lane.b32.xlu1 %v3292_v54, %s3394_s0 }
 0x5fb   : > { %v3294_v55 = vpop.eup %3293 }
 0x5fc   : > { %2009 = vrot.lane.b32.xlu0 %v3294_v55, %s3394_s0  ;;  %3168 = vmatprep.mubr.msk.f32.mxu1 %vm1926_vm10, %v3294_v55 }
 0x5fd   : > { %3169 = vmatmul.mubr.msk.f32.vlgmr.msra.gmra.mxu1 %vm1926_vm10, %v3292_v54 }
 0x5fe   : > { %2329 = vrot.lane.b32.xlu1 %v3048_v56, %s3395_s19  ;;  %3172 = vmatpush3.msra.mxu1 %v2008_v53  ;;  %v2403_v56 = vld [vmem:[#allocation4 + $0x90] sm:$0xff] }
 0x5ff   : > { %3176 = vmatprep.subr.mxu1 %v4102_v61 }
 0x600   : > { %2352 = vrot.lane.b32.xlu0 %v3049_v57, %s4446_s26 }
 0x602   : > { %2262 = vrot.lane.b32.xlu1 %v3045_v58, %s4458_s28  ;;  %v2402_v58 = vld [vmem:[#allocation4 + $0x80] sm:$0xff] }
 0x604   : > { %2306 = vrot.lane.b32.xlu0 %v3047_v60, %s4459_s25 }
 0x606   : > { %2191 = vrot.lane.b32.xlu1 %v3043_v62, %s3394_s0 }
 0x608   : > { %2226 = vrot.lane.b32.xlu0 %v3044_v63, %s3397_s29 }
 0x60a   : > { %2375 = vrot.lane.b32.xlu1 %v3050_v1, %s3398_s24 }
 0x60c   : > { %2155 = vrot.lane.b32.xlu0 %v3042_v2, %s3399_s18 }
 0x66c   : > { %v2012_v3 = vpop.permute.xlu1 %2011 }
 0x66e   : > { %v2010_v6 = vpop.permute.xlu0 %2009 }
 0x66f   : > { %3173 = vmatprep.mubr.msk.f32.mxu1 %vm1926_vm10, %v2010_v6 }
 0x670   : > { %3174 = vmatmul.mubr.msk.f32.vlgmr.msra.gmra.mxu1 %vm1926_vm10, %v2012_v3  ;;  %v2330_v9 = vpop.permute.xlu1 %2329 }
 0x671   : > { %v2332_v11 = vmul.f32 %v2330_v9, %v4135_v20  ;;  %v2333_v12 = vmul.f32 %v2330_v9, %v4139_v5  ;;  %3180 = vmatprep.mubr.msk.f32.mxu1 %vm3403_vm13, %v4102_v61 }
 0x672   : > { %v2353_v7 = vpop.permute.xlu0 %2352 }
 0x673   : > { %v2355_v8 = vmul.f32 %v2353_v7, %v4135_v20  ;;  %v2356_v0 = vmul.f32 %v2353_v7, %v4139_v5 }
 0x674   : > { %v2263_v15 = vpop.permute.xlu1 %2262 }
 0x675   : > { %2361 = vrot.lane.b32.xlu0 %v2356_v0, %s3394_s0  ;;  %2359 = vrot.lane.b32.xlu1 %v2355_v8, %s3394_s0  ;;  %v2265_v16 = vmul.f32 %v4102_v61, %v2263_v15  ;;  %v2268_v17 = vmul.f32 %v4139_v5, %v2263_v15  ;;  %v2266_v22 = vmul.f32 %v4135_v20, %v2263_v15 }
 0x676   : > { %v2307_v13 = vpop.permute.xlu0 %2306 }
 0x677   : > { %v2309_v14 = vmul.f32 %v2307_v13, %v4135_v20  ;;  %v2310_v59 = vmul.f32 %v2307_v13, %v4139_v5 }
 0x678   : > { %v2192_v25 = vpop.permute.xlu1 %2191 }
 0x679   : > { %2338 = vrot.lane.b32.xlu0 %v2333_v12, %s3397_s29  ;;  %2336 = vrot.lane.b32.xlu1 %v2332_v11, %s3397_s29  ;;  %v2194_v26 = vmul.f32 %v4102_v61, %v2192_v25  ;;  %v2197_v28 = vmul.f32 %v4139_v5, %v2192_v25  ;;  %v2195_v27 = vmul.f32 %v4135_v20, %v2192_v25 }
 0x67a   : > { %v2227_v23 = vpop.permute.xlu0 %2226 }
 0x67b   : > { %v2229_v19 = vmul.f32 %v4102_v61, %v2227_v23  ;;  %v2232_v48 = vmul.f32 %v4139_v5, %v2227_v23  ;;  %v2230_v24 = vmul.f32 %v4135_v20, %v2227_v23 }
 0x67c   : > { %v2376_v4 = vpop.permute.xlu1 %2375 }
 0x67d   : > { %2315 = vrot.lane.b32.xlu0 %v2310_v59, %s4458_s28  ;;  %2313 = vrot.lane.b32.xlu1 %v2309_v14, %s4458_s28  ;;  %s4465_s28 = smov 8   ;;  %v2378_v33 = vmul.f32 %v2376_v4, %v4135_v20  ;;  %v2379_v34 = vmul.f32 %v2376_v4, %v4139_v5 }
 0x67e   : > { %v2156_v29 = vpop.permute.xlu0 %2155 }
 0x67f   : > { %v2158_v30 = vmul.f32 %v4102_v61, %v2156_v29  ;;  %v2161_v32 = vmul.f32 %v4139_v5, %v2156_v29  ;;  %v2159_v21 = vmul.f32 %v4135_v20, %v2156_v29  ;;  %v2393_v29 = vld [vmem:[%s4421_s11 + $0x18] sm:$0xff] }
 0x681   : > { %2279 = vrot.lane.b32.xlu1 %v2268_v17, %s4459_s25  ;;  %2277 = vrot.lane.b32.xlu0 %v2265_v16, %s4459_s25 }
 0x685   : > { %2275 = vrot.lane.b32.xlu1 %v2266_v22, %s4459_s25  ;;  %2273 = vrot.lane.b32.xlu0 %v2265_v16, %s4459_s25 }
 0x689   : > { %2243 = vrot.lane.b32.xlu1 %v2232_v48, %s3395_s19  ;;  %2241 = vrot.lane.b32.xlu0 %v2229_v19, %s3395_s19 }
 0x68d   : > { %2239 = vrot.lane.b32.xlu1 %v2230_v24, %s3395_s19  ;;  %2237 = vrot.lane.b32.xlu0 %v2229_v19, %s3395_s19  ;;  %s458_s19 = sand.u32 1, %s3370_s30  }
 0x68e   : > { %s3009_s26 = sshll.u32 %s458_s19, 4  ;;  %s4369_s17 = scalar_lea.sflag [#allocation6], %s458_s19 }
 0x68f   : > { %s460_s15 = scalar_lea.vmem [#allocation5], %s3009_s26 }
 0x690   : > { %s2943_s21 = sshll.u32 %s460_s15, 4  ;;  %s4359_s21 = int_to_ptr.vmem [resolvable:$true] %s2943_s21 }
 0x691   : > { %2208 = vrot.lane.b32.xlu1 %v2197_v28, %s4465_s28  ;;  %2206 = vrot.lane.b32.xlu0 %v2194_v26, %s4465_s28  ;;  %v2390_v28 = vld [vmem:[%s4421_s11] sm:$0xff] }
 0x695   : > { %2204 = vrot.lane.b32.xlu1 %v2195_v27, %s4465_s28  ;;  %2202 = vrot.lane.b32.xlu0 %v2194_v26, %s4465_s28 }
 0x699   : > { %2172 = vrot.lane.b32.xlu1 %v2161_v32, %s3398_s24  ;;  %2170 = vrot.lane.b32.xlu0 %v2158_v30, %s3398_s24 }
 0x69d   : > { %2168 = vrot.lane.b32.xlu1 %v2159_v21, %s3398_s24  ;;  %2166 = vrot.lane.b32.xlu0 %v2158_v30, %s3398_s24  ;;  %v2392_v30 = vld [vmem:[%s4421_s11 + $0x10] sm:$0xff]  ;;  %s3318_s24 = scalar_lea.vmem %s4359_s21, 256 }
 0x69e   : > { %p3319_p11 = scmp.ne.s32.totalorder %s4359_s21, %s3318_s24 }
 0x6a0   : > { %p3320_p12 = pnand %p3319_p11, %p3519_p5 }
 0x6a1   : > { %2384 = vrot.lane.b32.xlu0 %v2379_v34, %s3399_s18  ;;  %2382 = vrot.lane.b32.xlu1 %v2378_v33, %s3399_s18  ;;  %s3404_s18 = smov [#allocation5]  }
 0x6a2   : > { %p3321_p13 = pneg %p3320_p12  ;;  %s3322_s25 = sshll.u32 %s3404_s18, 4  ;;  %s3323_s25 = int_to_ptr.vmem [resolvable:$false] %s3322_s25 }
 0x6a3   : > { %s3324_s0 = scalar_lea.vmem %s3323_s25, 512  ;;  %p3325_p0 = scmp.lt.s32.totalorder %s4359_s21, %s3323_s25 }
 0x6a4   : > { %p3326_p1 = scmp.lt.s32.totalorder %s3324_s0, %s3318_s24 }
 0x6a6   : > { %p3327_p2 = por %p3326_p1, %p3325_p0 }
 0x6a8   : > { %p3328_p3 = pnand %p3327_p2, %p3321_p13 }
 0x6bd   : > { %v3170_v32 = vpop.f32.mrf.mxu1 }
 0x6be   : > { %v2093_v4 = vmul.f32 %v3170_v32, %v4126_v31 }
 0x6bf   : > { %v1999_v21 = vpop.f32.mrf.mxu1 }
 0x6c0   : > { %v2092_v34 = vmul.f32 %v4120_v18, %v1999_v21 }
 0x6e7   : > { %v2362_v39 = vpop.permute.xlu0 %2361  ;;  %v2360_v40 = vpop.permute.xlu1 %2359 }
 0x6e8   : > { %2366 = vst.msk [vmem:[#allocation4 + $0xf0] sm:$0xff] %vm480_vm9, %v2362_v39  ;;  %2365 = vst.msk [vmem:[#allocation4 + $0xe0] sm:$0xff] %vm480_vm9, %v2360_v40 }
 0x6eb   : > { %v2339_v38 = vpop.permute.xlu0 %2338  ;;  %v2337_v20 = vpop.permute.xlu1 %2336 }
 0x6ec   : > { %2343 = vst.msk [vmem:[#allocation4 + $0xd0] sm:$0xff] %vm480_vm9, %v2339_v38  ;;  %2342 = vst.msk [vmem:[#allocation4 + $0xc0] sm:$0xff] %vm480_vm9, %v2337_v20 }
 0x6ef   : > { %v2316_v5 = vpop.permute.xlu0 %2315  ;;  %v2314_v42 = vpop.permute.xlu1 %2313  ;;  %v2409_v10 = vld [vmem:[#allocation4 + $0xf0] sm:$0xff]  ;;  %v2408_v43 = vld [vmem:[#allocation4 + $0xe0] sm:$0xff] }
 0x6f0   : > { %2320 = vst.msk [vmem:[#allocation4 + $0xb0] sm:$0xff] %vm480_vm9, %v2316_v5  ;;  %2319 = vst.msk [vmem:[#allocation4 + $0xa0] sm:$0xff] %vm480_vm9, %v2314_v42  ;;  %2427 = vmatpush1.msra.mxu0 %v2409_v10  ;;  %v3400_v5 = vmov 5   ;;  %v3401_v42 = vmov 6   ;;  %v3402_v10 = vmov 7  }
 0x6f1   : > { %2428 = vmatprep.subr.mxu0 %v4102_v61  ;;  %3282 = vset.pattern.permute.xlu1 %v3400_v5 }
 0x6f2   : > { %2429 = vmatpush1.msra.mxu0 %v2408_v43  ;;  %3283 = vset.pattern.permute.xlu0 %v3400_v5 }
 0x6f3   : > { %v2278_v44 = vpop.permute.xlu0 %2277  ;;  %2430 = vmatprep.subr.mxu0 %v4102_v61  ;;  %v2280_v41 = vpop.permute.xlu1 %2279  ;;  %v2407_v45 = vld [vmem:[#allocation4 + $0xd0] sm:$0xff]  ;;  %v2406_v47 = vld [vmem:[#allocation4 + $0xc0] sm:$0xff] }
 0x6f4   : > { %v2282_v46 = vsel %vm647_vm3, %v2278_v44, %v2280_v41  ;;  %2431 = vmatpush1.msra.mxu0 %v2407_v45 }
 0x6f5   : > { %2286 = vst.msk [vmem:[#allocation4 + $0x70] sm:$0xff] %vm480_vm9, %v2282_v46  ;;  %2432 = vmatprep.subr.mxu0 %v4102_v61 }
 0x6f6   : > { %2433 = vmatpush1.msra.mxu0 %v2406_v47 }
 0x6f7   : > { %v2274_v49 = vpop.permute.xlu0 %2273  ;;  %2434 = vmatprep.subr.mxu0 %v4102_v61  ;;  %v2276_v50 = vpop.permute.xlu1 %2275  ;;  %v2405_v51 = vld [vmem:[#allocation4 + $0xb0] sm:$0xff]  ;;  %v2404_v53 = vld [vmem:[#allocation4 + $0xa0] sm:$0xff] }
 0x6f8   : > { %v2281_v52 = vsel %vm647_vm3, %v2274_v49, %v2276_v50  ;;  %2435 = vmatpush1.msra.mxu0 %v2405_v51 }
 0x6f9   : > { %2285 = vst.msk [vmem:[#allocation4 + $0x60] sm:$0xff] %vm480_vm9, %v2281_v52  ;;  %2436 = vmatprep.subr.mxu0 %v4102_v61 }
 0x6fa   : > { %2437 = vmatpush1.msra.mxu0 %v2404_v53 }
 0x6fb   : > { %v2242_v54 = vpop.permute.xlu0 %2241  ;;  %2438 = vmatprep.subr.mxu0 %v4102_v61  ;;  %v2244_v55 = vpop.permute.xlu1 %2243 }
 0x6fc   : > { %v2247_v57 = vsel %vm2245_vm11, %v2242_v54, %v2244_v55  ;;  %2439 = vmatpush1.msra.mxu0 %v2403_v56  ;;  %v2401_v63 = vld [vmem:[#allocation4 + $0x70] sm:$0xff] }
 0x6fd   : > { %2251 = vst.msk [vmem:[#allocation4 + $0x50] sm:$0xff] %vm480_vm9, %v2247_v57  ;;  %2440 = vmatprep.subr.mxu0 %v4102_v61 }
 0x6fe   : > { %2441 = vmatpush1.msra.mxu0 %v2402_v58 }
 0x6ff   : > { %v2238_v60 = vpop.permute.xlu0 %2237  ;;  %2442 = vmatprep.subr.mxu0 %v4102_v61  ;;  %v2240_v62 = vpop.permute.xlu1 %2239 }
 0x700   : > { %v2246_v1 = vsel %vm2245_vm11, %v2238_v60, %v2240_v62  ;;  %2443 = vmatpush1.msra.mxu0 %v2401_v63  ;;  %v2400_v2 = vld [vmem:[#allocation4 + $0x60] sm:$0xff] }
 0x701   : > { %2250 = vst.msk [vmem:[#allocation4 + $0x40] sm:$0xff] %vm480_vm9, %v2246_v1  ;;  %2444 = vmatprep.subr.mxu0 %v4102_v61 }
 0x702   : > { %2445 = vmatpush1.msra.mxu0 %v2400_v2 }
 0x703   : > { %v2207_v3 = vpop.permute.xlu0 %2206  ;;  %v2209_v6 = vpop.permute.xlu1 %2208  ;;  %2446 = vmatprep.subr.mxu0 %v4102_v61 }
 0x704   : > { %v2211_v7 = vsel %vm1926_vm10, %v2207_v3, %v2209_v6  ;;  %v2399_v8 = vld [vmem:[#allocation4 + $0x50] sm:$0xff] }
 0x705   : > { %2215 = vst.msk [vmem:[#allocation4 + $0x30] sm:$0xff] %vm480_vm9, %v2211_v7  ;;  %2447 = vmatpush1.msra.mxu0 %v2399_v8 }
 0x706   : > { %2448 = vmatprep.subr.mxu0 %v4102_v61 }
 0x707   : > { %v2203_v0 = vpop.permute.xlu0 %2202  ;;  %v2205_v9 = vpop.permute.xlu1 %2204 }
 0x708   : > { %v2210_v11 = vsel %vm1926_vm10, %v2203_v0, %v2205_v9  ;;  %v2398_v12 = vld [vmem:[#allocation4 + $0x40] sm:$0xff] }
 0x709   : > { %2214 = vst.msk [vmem:[#allocation4 + $0x20] sm:$0xff] %vm480_vm9, %v2210_v11  ;;  %2449 = vmatpush1.msra.mxu0 %v2398_v12 }
 0x70a   : > { %2450 = vmatprep.subr.mxu0 %v4102_v61 }
 0x70b   : > { %v2171_v13 = vpop.permute.xlu0 %2170  ;;  %v2173_v14 = vpop.permute.xlu1 %2172 }
 0x70c   : > { %v2176_v59 = vsel %vm2174_vm12, %v2171_v13, %v2173_v14  ;;  %v2397_v15 = vld [vmem:[#allocation4 + $0x30] sm:$0xff] }
 0x70d   : > { %2180 = vst.msk [vmem:[#allocation4 + $0x10] sm:$0xff] %vm480_vm9, %v2176_v59  ;;  %2451 = vmatpush1.msra.mxu0 %v2397_v15 }
 0x70e   : > { %2452 = vmatprep.subr.mxu0 %v4102_v61 }
 0x70f   : > { %v2167_v16 = vpop.permute.xlu0 %2166  ;;  %v2169_v17 = vpop.permute.xlu1 %2168 }
 0x710   : > { %v2175_v22 = vsel %vm2174_vm12, %v2167_v16, %v2169_v17  ;;  %v2396_v23 = vld [vmem:[#allocation4 + $0x20] sm:$0xff] }
 0x711   : > { %2179 = vst.msk [vmem:[#allocation4] sm:$0xff] %vm480_vm9, %v2175_v22  ;;  %2453 = vmatpush1.msra.mxu0 %v2396_v23 }
 0x712   : > { %2454 = vmatprep.subr.mxu0 %v4102_v61 }
 0x713   : > { %v2385_v19 = vpop.permute.xlu0 %2384  ;;  %v2383_v48 = vpop.permute.xlu1 %2382 }
 0x714   : > { %2389 = vst.msk [vmem:[#allocation4 + $0x110] sm:$0xff] %vm480_vm9, %v2385_v19  ;;  %2388 = vst.msk [vmem:[#allocation4 + $0x100] sm:$0xff] %vm480_vm9, %v2383_v48  ;;  %v2395_v24 = vld [vmem:[#allocation4 + $0x10] sm:$0xff] }
 0x715   : > { %2455 = vmatpush1.msra.mxu0 %v2395_v24 }
 0x716   : > { %2456 = vmatprep.subr.mxu0 %v4102_v61 }
 0x718   : > { %v2394_v25 = vld [vmem:[#allocation4] sm:$0xff] }
 0x719   : > { %2457 = vmatpush1.msra.mxu0 %v2394_v25 }
 0x71a   : > { %2486 = vmatprep.subr.mxu0 %v4102_v61 }
 0x71b   : > { %v2411_v26 = vld [vmem:[#allocation4 + $0x110] sm:$0xff]  ;;  %v2410_v27 = vld [vmem:[#allocation4 + $0x100] sm:$0xff] }
 0x71c   : > { %2487 = vmatpush2.msra.mxu0 %v2411_v26 }
 0x71d   : > { %2488 = vmatprep.subr.mxu0 %v4102_v61 }
 0x71e   : > { %2489 = vmatpush2.msra.mxu0 %v2410_v27 }
 0x71f   : > { %2491 = vmatmul.mubr.f32.vlgmr.msra.gmra.mxu0 %v2390_v28 }
 0x720   : > { %3052 = vmatprep.mubr.msk.f32.mxu0 %vm563_vm1, %v2393_v29 }
 0x723   : > { %2496 = vmatmul.mubr.f32.gmra.mxu0 %v2392_v30 }
 0x730   : > { %v3175_v33 = vpop.f32.mrf.mxu1 }
 0x731   : > { %v2095_v37 = vmul.f32 %v3175_v33, %v2093_v4 }
 0x732   : > { %v2083_v39 = vpop.f32.mrf.mxu1 }
 0x733   : > { %v2094_v40 = vmul.f32 %v2092_v34, %v2083_v39  ;;  %v2099_v38 = vsel %vm480_vm9, %v2095_v37, 0.0 }
 0x734   : > { %2100 = vadd.xlane.f32.xlu1 %v2099_v38 }
 0x735   : > { %v2096_v20 = vsel %vm480_vm9, %v2094_v40, 0.0 }
 0x736   : > { %2097 = vadd.xlane.f32.xlu0 %v2096_v20 }
 0x745   : > { %2124 = vperm.xlu1 %3282, %v4150_v35  }
 0x749   : > { %3284 = vset.pattern.permute.xlu1 %v3401_v42 }
 0x74a   : > { %2134 = vperm.xlu1 %3284, %v4150_v35  }
 0x74e   : > { %2138 = vperm.xlu1 %3284, %v4156_v36  }
 0x752   : > { %3285 = vset.pattern.permute.xlu1 %v3402_v10 }
 0x753   : > { %2413 = vperm.xlu1 %3285, %v4150_v35  }
 0x757   : > { %2417 = vperm.xlu1 %3285, %v4156_v36  }
 0x7bd   : > { %v2101_v43 = vpop.xlane.xlu1 %2100 }
 0x7be   : > { %v2104_v44 = vmul.f32 0.015625, %v2101_v43 }
 0x7bf   : > { %v2098_v41 = vpop.xlane.xlu0 %2097 }
 0x7c0   : > { %v2106_v45 = vsub.f32 %v2095_v37, %v2104_v44  ;;  %v2103_v46 = vmul.f32 0.015625, %v2098_v41 }
 0x7c1   : > { %v2125_v63 = vpop.permute.xlu1 %2124 }
 0x7c2   : > { %v2105_v47 = vsub.f32 %v2094_v40, %v2103_v46  ;;  %v2108_v49 = vmul.f32 %v2106_v45, %v2106_v45 }
 0x7c4   : > { %v2112_v50 = vsel %vm480_vm9, %v2108_v49, 0.0  ;;  %v2107_v51 = vmul.f32 %v2105_v47, %v2105_v47 }
 0x7c5   : > { %2113 = vadd.xlane.f32.xlu0 %v2112_v50  ;;  %v2135_v2 = vpop.permute.xlu1 %2134 }
 0x7c6   : > { %v2109_v52 = vsel %vm480_vm9, %v2107_v51, 0.0 }
 0x7c9   : > { %2110 = vadd.xlane.f32.xlu0 %v2109_v52  ;;  %v2139_v7 = vpop.permute.xlu1 %2138 }
 0x7ce   : > { %v2414_v12 = vpop.permute.xlu1 %2413 }
 0x7d2   : > { %v2418_v17 = vpop.permute.xlu1 %2417 }
 0x7df   : > { %2128 = vperm.xlu0 %3283, %v4156_v36   ;;  %v2492_v35 = vpop.f32.mrf.mxu0 }
 0x7e0   : > { %v2493_v15 = vadd.f32 %v2492_v35, %v2414_v12 }
 0x7e1   : > { %v2494_v53 = vpop.f32.mrf.mxu0 }
 0x7e2   : > { %v2509_v22 = vsel %vm480_vm9, %v2493_v15, 0.0 }
 0x7e3   : > { %3286 = vset.pattern.permute.xlu0 %v3402_v10  ;;  %v2497_v54 = vpop.f32.mrf.mxu0 }
 0x7e4   : > { %v2498_v23 = vadd.f32 %v2497_v54, %v2418_v17 }
 0x7e5   : > { %v2499_v55 = vpop.f32.mrf.mxu0 }
 0x7e6   : > { %v2512_v19 = vsel %vm480_vm9, %v2498_v23, 0.0  ;;  %v2543_v55 = vld [vmem:[%s4418_s8] sm:$0xff] }
 0x84e   : > { %v2114_v56 = vpop.xlane.xlu0 %2113 }
 0x84f   : > { %v2116_v57 = vmul.f32 0.015625, %v2114_v56 }
 0x851   : > { %v2118_v58 = vadd.f32 1e-05, %v2116_v57 }
 0x852   : > { %v2111_v60 = vpop.xlane.xlu0 %2110 }
 0x853   : > { %3295 = vrsqrt.f32 %v2118_v58  ;;  %v2115_v62 = vmul.f32 0.015625, %v2111_v60 }
 0x855   : > { %v2117_v1 = vadd.f32 1e-05, %v2115_v62  ;;  %v2836_v62 = vld [vmem:[%s4417_s7] sm:$0xff] }
 0x857   : > { %3297 = vrsqrt.f32 %v2117_v1 }
 0x85a   : > { %v2129_v6 = vpop.permute.xlu0 %2128 }
 0x860   : > { %v3296_v3 = vpop.eup %3295 }
 0x861   : > { %v2122_v8 = vmul.f32 %v3296_v3, %v2106_v45 }
 0x863   : > { %v2132_v36 = vmul.f32 %v2129_v6, %v2122_v8 }
 0x864   : > { %v3298_v0 = vpop.eup %3297 }
 0x865   : > { %v2121_v9 = vmul.f32 %v3298_v0, %v2105_v47  ;;  %v4314_v11 = vadd.f32 %v2139_v7, %v2132_v36 }
 0x867   : > { %v2131_v13 = vmul.f32 %v2125_v63, %v2121_v9  ;;  %v2504_v14 = vsel %vm480_vm9, %v4314_v11, 0.0 }
 0x868   : > { %2505 = vadd.xlane.f32.xlu0 %v2504_v14 }
 0x869   : > { %v4318_v59 = vadd.f32 %v2135_v2, %v2131_v13 }
 0x86b   : > { %v2501_v16 = vsel %vm480_vm9, %v4318_v59, 0.0 }
 0x86c   : > { %2502 = vadd.xlane.f32.xlu1 %v2501_v16  ;;  %v2837_v16 = vld [vmem:[%s4417_s7 + $0x8] sm:$0xff] }
 0x870   : > { %2510 = vadd.xlane.f32.xlu1 %v2509_v22 }
 0x874   : > { %2513 = vadd.xlane.f32.xlu1 %v2512_v19 }
 0x8f1   : > { %v2506_v48 = vpop.xlane.xlu0 %2505 }
 0x8f2   : > { %v2508_v25 = vmul.f32 0.015625, %v2506_v48 }
 0x8f5   : > { %v2503_v24 = vpop.xlane.xlu1 %2502 }
 0x8f6   : > { %v2507_v26 = vmul.f32 0.015625, %v2503_v24 }
 0x8f8   : > { %v2517_v28 = vmax.f32 %v2507_v26, %v2508_v25 }
 0x8f9   : > { %v2511_v27 = vpop.xlane.xlu1 %2510 }
 0x8fa   : > { %v2518_v29 = vrot.slane %v2517_v28, 4  ;;  %v2515_v4 = vmul.f32 0.015625, %v2511_v27 }
 0x8fc   : > { %v2519_v30 = vmax.f32 %v2517_v28, %v2518_v29 }
 0x8fd   : > { %v2514_v32 = vpop.xlane.xlu1 %2513 }
 0x8fe   : > { %v2520_v21 = vrot.slane %v2519_v30, 2  ;;  %v2516_v33 = vmul.f32 0.015625, %v2514_v32 }
 0x900   : > { %v2521_v34 = vmax.f32 %v2519_v30, %v2520_v21  ;;  %v2530_v37 = vmax.f32 %v2515_v4, %v2516_v33 }
 0x902   : > { %v2522_v39 = vrot.slane %v2521_v34, 1  ;;  %v2531_v40 = vrot.slane %v2530_v37, 4 }
 0x904   : > { %v2523_v38 = vmax.f32 %v2521_v34, %v2522_v39  ;;  %v2532_v20 = vmax.f32 %v2530_v37, %v2531_v40 }
 0x906   : > { %v2524_v5 = vsub.f32 %v2507_v26, %v2523_v38  ;;  %v2525_v42 = vsub.f32 %v2508_v25, %v2523_v38  ;;  %v2533_v10 = vrot.slane %v2532_v20, 2 }
 0x908   : > { %v2526_v43 = vmul.f32 1.442695, %v2524_v5  ;;  %v2528_v44 = vmul.f32 1.442695, %v2525_v42  ;;  %v2534_v41 = vmax.f32 %v2532_v20, %v2533_v10 }
 0x90a   : > { %3299 = vpow2.f32 %v2526_v43  ;;  %v2535_v45 = vrot.slane %v2534_v41, 1 }
 0x90b   : > { %3301 = vpow2.f32 %v2528_v44 }
 0x90c   : > { %v2536_v46 = vmax.f32 %v2534_v41, %v2535_v45 }
 0x90e   : > { %v2537_v47 = vsub.f32 %v2515_v4, %v2536_v46  ;;  %v2538_v49 = vsub.f32 %v2516_v33, %v2536_v46 }
 0x910   : > { %v2539_v50 = vmul.f32 1.442695, %v2537_v47  ;;  %v2541_v51 = vmul.f32 1.442695, %v2538_v49 }
 0x912   : > { %3303 = vpow2.f32 %v2539_v50 }
 0x913   : > { %3305 = vpow2.f32 %v2541_v51 }
 0x917   : > { %v3300_v52 = vpop.eup %3299 }
 0x918   : > { %v3302_v35 = vpop.eup %3301  ;;  %v2544_v54 = vmul.f32 %v3300_v52, %v2493_v15 }
 0x919   : > { %v2545_v53 = vmul.f32 %v3302_v35, %v2498_v23 }
 0x91b   : > { %3177 = vmatpush3.msra.mxu1 %v2545_v53 }
 0x91c   : > { %3178 = vmatprep.subr.mxu1 %v4102_v61 }
 0x91d   : > { %3179 = vmatpush3.msra.mxu1 %v2544_v54 }
 0x91e   : > { %3181 = vmatmul.mubr.msk.f32.vlgmr.msra.gmra.mxu1 %vm563_vm1, %v2543_v55  ;;  %3183 = vmatprep.subr.mxu1 %v4102_v61 }
 0x91f   : > { %v3304_v56 = vpop.eup %3303  ;;  %3184 = vmatpush3.msra.mxu1 %v3302_v35  ;;  %3187 = vmatprep.mubr.msk.f32.mxu1 %vm3403_vm13, %v4102_v61 }
 0x920   : > { %v3306_v57 = vpop.eup %3305  ;;  %3185 = vmatprep.subr.mxu1 %v4102_v61  ;;  %v2689_v60 = vmul.f32 %v3304_v56, %v4318_v59 }
 0x921   : > { %3186 = vmatpush3.msra.mxu1 %v3300_v52  ;;  %v2690_v58 = vmul.f32 %v3306_v57, %v4314_v11 }
 0x922   : > { %3188 = vmatmul.mubr.msk.f32.vlgmr.msra.gmra.mxu1 %vm563_vm1, %v2543_v55  ;;  %3190 = vmatprep.subr.mxu1 %v4102_v61 }
 0x923   : > { %3191 = vmatpush3.msra.mxu1 %v2690_v58  ;;  %3194 = vmatprep.mubr.msk.f32.mxu1 %vm3403_vm13, %v4102_v61 }
 0x924   : > { %3192 = vmatprep.subr.mxu1 %v4102_v61 }
 0x925   : > { %3193 = vmatpush3.msra.mxu1 %v2689_v60 }
 0x926   : > { %3195 = vmatmul.mubr.msk.f32.vlgmr.msra.gmra.mxu1 %vm563_vm1, %v2543_v55  ;;  %3197 = vmatprep.subr.mxu1 %v4102_v61 }
 0x927   : > { %3198 = vmatpush3.msra.mxu1 %v3306_v57  ;;  %3201 = vmatprep.mubr.msk.f32.mxu1 %vm3403_vm13, %v4102_v61 }
 0x928   : > { %3199 = vmatprep.subr.mxu1 %v4102_v61 }
 0x929   : > { %3200 = vmatpush3.msra.mxu1 %v3304_v56 }
 0x92a   : > { %3202 = vmatmul.mubr.msk.f32.vlgmr.msra.gmra.mxu1 %vm563_vm1, %v2543_v55 }
 0x92b   : > { %3206 = vmatprep.mubr.msk.f32.mxu1 %vm1926_vm10, %v2836_v62 }
 0x9de   : > { %v2615_v63 = vpop.f32.mrf.mxu1 }
 0x9e0   : > { %v3182_v1 = vpop.f32.mrf.mxu1 }
 0x9e2   : > { %v2685_v2 = vpop.f32.mrf.mxu1 }
 0x9e3   : > { %3307 = vrcp.f32 %v2685_v2 }
 0x9e4   : > { %v3189_v3 = vpop.f32.mrf.mxu1 }
 0x9e6   : > { %v2757_v6 = vpop.f32.mrf.mxu1 }
 0x9e8   : > { %v3196_v7 = vpop.f32.mrf.mxu1 }
 0x9ea   : > { %v2827_v8 = vpop.f32.mrf.mxu1 }
 0x9eb   : > { %3309 = vrcp.f32 %v2827_v8 }
 0x9ec   : > { %v3203_v36 = vpop.f32.mrf.mxu1 }
 0x9f0   : > { %v3308_v61 = vpop.eup %3307 }
 0x9f1   : > { %v2832_v9 = vmul.f32 %v3308_v61, %v2615_v63 }
 0x9f8   : > { %v3310_v0 = vpop.eup %3309 }
 0x9f9   : > { %v2834_v11 = vmul.f32 %v3310_v0, %v2757_v6 }
 0x9fb   : > { %v2835_v12 = vadd.f32 %v2834_v11, %v2832_v9 }
 0x9fd   : > { %v3057_v13 = vmul.f32 -1.442695, %v2835_v12 }
 0x9ff   : > { %3311 = vpow2.f32 %v3057_v13 }
 0xa0c   : > { %v3312_v14 = vpop.eup %3311 }
 0xa0d   : > { %v2841_v59 = vadd.f32 1.0, %v3312_v14 }
 0xa0f   : > { %3313 = vrcp.f32 %v2841_v59 }
 0xa1c   : > { %v3314_v15 = vpop.eup %3313 }
 0xa1d   : > { %3204 = vmatprep.subr.mxu1 %v3314_v15 }
 0xa1e   : > { %3205 = vmatpush3.msra.mxu1 %v3314_v15 }
 0xa1f   : > { %3207 = vmatmul.mubr.msk.f32.vlgmr.msra.gmra.mxu1 %vm1926_vm10, %v2837_v16 }
 0xadf   : > { %v3208_v17 = vpop.f32.mrf.mxu1 }
 0xae0   : > { %v2926_v22 = vmul.f32 %v3208_v17, %v4126_v31 }
 0xae1   : > { %v2916_v23 = vpop.f32.mrf.mxu1 }
 0xae2   : > { %2928 = vst.msk [vmem:[%s460_s15 + $0x8] sm:$0xff] %vm480_vm9, %v2926_v22  ;;  %v2925_v19 = vmul.f32 %v4120_v18, %v2916_v23 }
 0xae4   : > { %2927 = vst.msk [vmem:[%s460_s15] sm:$0xff] %vm480_vm9, %v2925_v19 }
 0xae5   : > { %3331 = shalt.err (!%p3328_p3)
}
 0xae6   : > { %s3332_s19 = scalar_lea.hbm %s4366_s27, 256  ;;  %s3336_s20 = scalar_lea.hbm %s4424_s14, 512 }
 0xae7   : > { %p3333_p4 = scmp.ne.s32.totalorder %s4366_s27, %s3332_s19  ;;  %p3337_p9 = scmp.lt.s32.totalorder %s4366_s27, %s4424_s14 }
 0xae8   : > { %p3338_p10 = scmp.lt.s32.totalorder %s3336_s20, %s3332_s19 }
 0xae9   : > { %p3334_p7 = pnand %p3333_p4, %p3519_p5 }
 0xaea   : > { %p3339_p11 = por %p3338_p10, %p3337_p9 }
 0xaeb   : > { %p3335_p8 = pneg %p3334_p7 }
 0xaed   : > { %p3340_p12 = pnand %p3339_p11, %p3335_p8 }
 0xaef   : > { %3343 = shalt.err (!%p3340_p12)
}
 0xaf0   : > { %s3405_s24 = smov 128  }
 0xaf1   : > { %3209 = dma.vmem_to_hbm [thread:$0]  (%p3519_p5), %s4359_s21, 256, %s4366_s27, %s4369_s17, %s3405_s24, %s3405_s24, %s4465_s28  }
 0xaf2 PF: > { %s4466_s18 = sld [smem:[#allocation8_spill]]  ;;  %p3215_p13 = scmp.ge.s32.totalorder %s3378_s16, 2 }
 0xaf4   : > { %p3212_p0 = pnand %p3215_p13, %p3523_p6 }
 0xaf6   : > { %p3213_p1 = pneg %p3212_p0 }
 0xaf8   : > { %s2958_s0 = sand.u32 1, %s4466_s18  }
 0xaf9   : > { %s2959_s19 = scalar_lea.sflag [#allocation6], %s2958_s0 }
 0xafa   : > { %3361 = dma.done.wait (%p3213_p1), %s2959_s19, 256  }
 0xafb   : > { %3363 = vsyncadd (%p3213_p1), %s2959_s19, 4294967040  ;;  %s4468_s16 = sld [smem:[#allocation10_spill]]  ;;  %s4471_s29 = smov %s3370_s30 }
 0xafc   : > { %s4469_s23 = sld [smem:[#allocation9_spill]] }
 0xafd   : > { %s4470_s15 = sld [smem:[#allocation11_spill]] }
 0xb01   : > { %p24_p2 = scmp.ge.s32.totalorder %s4468_s16, 4  }
 0xb02   : > { %s4472_s30 = smov %s4469_s23 }
 0xb03   :  { %26 = sbr.rel (!%p24_p2) target bundleno = 5 (0x5), region = 119 }
 0xb08   :  { %2964 = vsyncpa [#allocation6], 1 }
 0xb09   :  { %2966 = vsyncpa [#allocation6 + $0x1], 1 }

</bundles_post_ra>
